<compile_context>
chip_gen: v7x
topology: tpu7x:2x2x1
jax: 0.10.0
libtpu: 0.0.40
codegen_flags: <defaults>
</compile_context>

<pallas_src>
import jax
import jax.numpy as jnp
from jax.experimental import pallas as pl
from jax.experimental.pallas import tpu as pltpu

CLIP_DIM = 512
DINO_DIM = 384                           # 3 * 128 -> lane aligned
HIDDEN_DIM = 512
OUT_DIM = 2
OUT_PAD = 128                            # lane-dense padded output width
TB_MAX = 512                             # batch tile (rows) for large batches


def _mlp_kernel(clip_ref, dino_ref,
                w1c_ref, w1d_ref, b1_ref,
                w2_ref, b2_ref,
                w3_ref, b3_ref,
                o_ref):
    # Split first GEMM avoids ever materializing the [B,896] concat.
    h1 = jnp.dot(clip_ref[...], w1c_ref[...], preferred_element_type=jnp.float32)
    h1 = h1 + jnp.dot(dino_ref[...], w1d_ref[...], preferred_element_type=jnp.float32)
    h1 = jnp.maximum(h1 + b1_ref[...], 0.0)                       # f32 epilogue

    h2 = jnp.dot(h1.astype(jnp.bfloat16), w2_ref[...],
                 preferred_element_type=jnp.float32)
    h2 = jnp.maximum(h2 + b2_ref[...], 0.0)                       # f32 epilogue

    logits = jnp.dot(h2.astype(jnp.bfloat16), w3_ref[...],
                     preferred_element_type=jnp.float32)
    o_ref[...] = jax.nn.sigmoid(logits + b3_ref[...]).astype(o_ref.dtype)


def prepare_params(params):
    """One-time packing: split W1, cast matmul weights to bf16, pad the tiny
    (512,2) head to 128 lanes, reshape biases to (1,-1) f32."""
    w1, b1, w2, b2, w3, b3 = params
    w1c = w1[:CLIP_DIM, :].astype(jnp.bfloat16)                   # [512, 512]
    w1d = w1[CLIP_DIM:, :].astype(jnp.bfloat16)                   # [384, 512]
    w2b = w2.astype(jnp.bfloat16)                                 # [512, 512]
    w3p = jnp.pad(w3, ((0, 0), (0, OUT_PAD - OUT_DIM))).astype(jnp.bfloat16)
    b1r = b1.reshape(1, -1).astype(jnp.float32)
    b2r = b2.reshape(1, -1).astype(jnp.float32)
    b3p = jnp.pad(b3.reshape(1, -1), ((0, 0), (0, OUT_PAD - OUT_DIM))).astype(jnp.float32)
    return (w1c, w1d, b1r, w2b, b2r, w3p, b3p)


def dino_material_mlp(clip_embedding, dino_embedding, packed_params):
    """clip: [B,512], dino: [B,384] float32. Returns [B,2] float32 in (0,1)."""
    w1c, w1d, b1, w2, b2, w3p, b3p = packed_params
    B = clip_embedding.shape[0]

    # Batch padding: multiple of 16 (bf16 sublane packing). For big batches,
    # pad up to a multiple of the batch tile so the grid divides evenly.
    if B <= TB_MAX:
        B_pad = max(16, ((B + 15) // 16) * 16)
        tb = B_pad
    else:
        B_pad = ((B + TB_MAX - 1) // TB_MAX) * TB_MAX
        tb = TB_MAX

    clip = clip_embedding.astype(jnp.bfloat16)
    dino = dino_embedding.astype(jnp.bfloat16)
    if B_pad != B:
        clip = jnp.pad(clip, ((0, B_pad - B), (0, 0)))
        dino = jnp.pad(dino, ((0, B_pad - B), (0, 0)))

    num_tiles = B_pad // tb
    resident = lambda shape: pl.BlockSpec(shape, lambda i: (0, 0))

    out = pl.pallas_call(
        _mlp_kernel,
        out_shape=jax.ShapeDtypeStruct((B_pad, OUT_PAD), jnp.float32),
        grid_spec=pltpu.PrefetchScalarGridSpec(
            num_scalar_prefetch=0,
            grid=(num_tiles,),
            in_specs=[
                pl.BlockSpec((tb, CLIP_DIM), lambda i: (i, 0)),   # clip (streamed)
                pl.BlockSpec((tb, DINO_DIM), lambda i: (i, 0)),   # dino (streamed)
                resident((CLIP_DIM, HIDDEN_DIM)),                 # W1_clip (resident)
                resident((DINO_DIM, HIDDEN_DIM)),                 # W1_dino (resident)
                resident((1, HIDDEN_DIM)),                        # b1
                resident((HIDDEN_DIM, HIDDEN_DIM)),               # W2
                resident((1, HIDDEN_DIM)),                        # b2
                resident((HIDDEN_DIM, OUT_PAD)),                  # W3 (padded)
                resident((1, OUT_PAD)),                           # b3 (padded)
            ],
            out_specs=pl.BlockSpec((tb, OUT_PAD), lambda i: (i, 0)),
        ),
        compiler_params=pltpu.CompilerParams(
            dimension_semantics=("parallel",),
        ),
    )(clip, dino, w1c, w1d, b1, w2, b2, w3p, b3p)
    return out[:B, :OUT_DIM]


def init_params(key):
    """Deterministic synthetic init matching nn.Linear shapes (stored as
    (in_features, out_features), i.e. transpose of PyTorch storage)."""
    ks = jax.random.split(key, 6)

    def lin(kw, kb, fan_in, fan_out):
        bound = 1.0 / jnp.sqrt(fan_in)
        w = jax.random.uniform(kw, (fan_in, fan_out), jnp.float32, -bound, bound)
        b = jax.random.uniform(kb, (fan_out,), jnp.float32, -bound, bound)
        return w, b

    w1, b1 = lin(ks[0], ks[1], CLIP_DIM + DINO_DIM, HIDDEN_DIM)
    w2, b2 = lin(ks[2], ks[3], HIDDEN_DIM, HIDDEN_DIM)
    w3, b3 = lin(ks[4], ks[5], HIDDEN_DIM, OUT_DIM)
    return (w1, b1, w2, b2, w3, b3)


def dino_material_net_forward(clip_embedding, dino_embedding, packed_params):
    return dino_material_mlp(clip_embedding, dino_embedding, packed_params)


if __name__ == "__main__":
    key = jax.random.PRNGKey(0)
    k_params, k_clip, k_dino = jax.random.split(key, 3)

    params = init_params(k_params)
    packed = prepare_params(params)          # one-time packing, not per-call

    B = 2
    # Synthetic stand-ins for the frozen CLIP / DINO image embeddings.
    clip_embedding = jax.random.normal(k_clip, (B, CLIP_DIM), jnp.float32)
    dino_embedding = jax.random.normal(k_dino, (B, DINO_DIM), jnp.float32)

    out = dino_material_net_forward(clip_embedding, dino_embedding, packed)
    out = jax.block_until_ready(out)

    # Reference check in plain JAX (f32). bf16 matmul operands introduce a
    # small, bounded deviation; accumulation and epilogue stay f32.
    w1, b1, w2, b2, w3, b3 = params
    x = jnp.concatenate([clip_embedding, dino_embedding], axis=-1)
    h = jnp.maximum(x @ w1 + b1, 0.0)
    h = jnp.maximum(h @ w2 + b2, 0.0)
    ref = jax.nn.sigmoid(h @ w3 + b3)

    assert out.shape == (B, 2), out.shape
    assert bool(jnp.all((out > 0.0) & (out < 1.0)))
    assert jnp.allclose(out, ref, atol=3e-2), float(jnp.abs(out - ref).max())

    print("KERNEL_OK")
</pallas_src>

<mosaic_0001>
module attributes {stable_mosaic.version = 11 : i64} {
  func.func @_mlp_kernel(%arg0: i32, %arg1: memref<16x512xbf16, #tpu.memory_space<vmem>>, %arg2: memref<16x384xbf16, #tpu.memory_space<vmem>>, %arg3: memref<512x512xbf16, #tpu.memory_space<vmem>>, %arg4: memref<384x512xbf16, #tpu.memory_space<vmem>>, %arg5: memref<1x512xf32, #tpu.memory_space<vmem>>, %arg6: memref<512x512xbf16, #tpu.memory_space<vmem>>, %arg7: memref<1x512xf32, #tpu.memory_space<vmem>>, %arg8: memref<512x128xbf16, #tpu.memory_space<vmem>>, %arg9: memref<1x128xf32, #tpu.memory_space<vmem>>, %arg10: memref<16x128xf32, #tpu.memory_space<vmem>>) attributes {dimension_semantics = [#tpu.dimension_semantics<parallel>], iteration_bounds = array<i64: 1>, scalar_prefetch = 0 : i64, scratch_operands = 0 : i64, tpu.core_type = #tpu.core_type<tc>, window_params = [{transform_indices = @transform_0, window_bounds = array<i64: 16, 512>}, {transform_indices = @transform_1, window_bounds = array<i64: 16, 384>}, {pipeline_mode = #tpu.pipeline_mode<synchronous>, transform_indices = @transform_2, window_bounds = array<i64: 512, 512>}, {pipeline_mode = #tpu.pipeline_mode<synchronous>, transform_indices = @transform_3, window_bounds = array<i64: 384, 512>}, {pipeline_mode = #tpu.pipeline_mode<synchronous>, transform_indices = @transform_4, window_bounds = array<i64: 1, 512>}, {pipeline_mode = #tpu.pipeline_mode<synchronous>, transform_indices = @transform_5, window_bounds = array<i64: 512, 512>}, {pipeline_mode = #tpu.pipeline_mode<synchronous>, transform_indices = @transform_6, window_bounds = array<i64: 1, 512>}, {pipeline_mode = #tpu.pipeline_mode<synchronous>, transform_indices = @transform_7, window_bounds = array<i64: 512, 128>}, {pipeline_mode = #tpu.pipeline_mode<synchronous>, transform_indices = @transform_8, window_bounds = array<i64: 1, 128>}, {transform_indices = @transform_9, window_bounds = array<i64: 16, 128>}]} {
    %c0 = arith.constant 0 : index
    %c0_0 = arith.constant 0 : index
    %0 = vector.load %arg1[%c0, %c0_0] : memref<16x512xbf16, #tpu.memory_space<vmem>>, vector<16x512xbf16>
    %c0_1 = arith.constant 0 : index
    %c0_2 = arith.constant 0 : index
    %1 = vector.load %arg3[%c0_1, %c0_2] : memref<512x512xbf16, #tpu.memory_space<vmem>>, vector<512x512xbf16>
    %cst = arith.constant dense<0.000000e+00> : vector<16x512xf32>
    %2 = tpu.matmul %0, %1, %cst {dimension_numbers = #tpu.dot_dimension_numbers<[1], [0], [0], [1], [0, 0, 1, 1], [], []>} : vector<16x512xbf16>, vector<512x512xbf16>, vector<16x512xf32> -> vector<16x512xf32>
    %c0_3 = arith.constant 0 : index
    %c0_4 = arith.constant 0 : index
    %3 = vector.load %arg2[%c0_3, %c0_4] : memref<16x384xbf16, #tpu.memory_space<vmem>>, vector<16x384xbf16>
    %c0_5 = arith.constant 0 : index
    %c0_6 = arith.constant 0 : index
    %4 = vector.load %arg4[%c0_5, %c0_6] : memref<384x512xbf16, #tpu.memory_space<vmem>>, vector<384x512xbf16>
    %cst_7 = arith.constant dense<0.000000e+00> : vector<16x512xf32>
    %5 = tpu.matmul %3, %4, %cst_7 {dimension_numbers = #tpu.dot_dimension_numbers<[1], [0], [0], [1], [0, 0, 1, 1], [], []>} : vector<16x384xbf16>, vector<384x512xbf16>, vector<16x512xf32> -> vector<16x512xf32>
    %6 = arith.addf %2, %5 : vector<16x512xf32>
    %c0_8 = arith.constant 0 : index
    %c0_9 = arith.constant 0 : index
    %7 = vector.load %arg5[%c0_8, %c0_9] : memref<1x512xf32, #tpu.memory_space<vmem>>, vector<1x512xf32>
    %8 = vector.broadcast %7 : vector<1x512xf32> to vector<16x512xf32>
    %9 = arith.addf %6, %8 : vector<16x512xf32>
    %cst_10 = arith.constant 0.000000e+00 : f32
    %10 = vector.broadcast %cst_10 : f32 to vector<16x512xf32>
    %11 = arith.maximumf %9, %10 : vector<16x512xf32>
    %12 = arith.truncf %11 : vector<16x512xf32> to vector<16x512xbf16>
    %c0_11 = arith.constant 0 : index
    %c0_12 = arith.constant 0 : index
    %13 = vector.load %arg6[%c0_11, %c0_12] : memref<512x512xbf16, #tpu.memory_space<vmem>>, vector<512x512xbf16>
    %cst_13 = arith.constant dense<0.000000e+00> : vector<16x512xf32>
    %14 = tpu.matmul %12, %13, %cst_13 {dimension_numbers = #tpu.dot_dimension_numbers<[1], [0], [0], [1], [0, 0, 1, 1], [], []>} : vector<16x512xbf16>, vector<512x512xbf16>, vector<16x512xf32> -> vector<16x512xf32>
    %c0_14 = arith.constant 0 : index
    %c0_15 = arith.constant 0 : index
    %15 = vector.load %arg7[%c0_14, %c0_15] : memref<1x512xf32, #tpu.memory_space<vmem>>, vector<1x512xf32>
    %16 = vector.broadcast %15 : vector<1x512xf32> to vector<16x512xf32>
    %17 = arith.addf %14, %16 : vector<16x512xf32>
    %cst_16 = arith.constant 0.000000e+00 : f32
    %18 = vector.broadcast %cst_16 : f32 to vector<16x512xf32>
    %19 = arith.maximumf %17, %18 : vector<16x512xf32>
    %20 = arith.truncf %19 : vector<16x512xf32> to vector<16x512xbf16>
    %c0_17 = arith.constant 0 : index
    %c0_18 = arith.constant 0 : index
    %21 = vector.load %arg8[%c0_17, %c0_18] : memref<512x128xbf16, #tpu.memory_space<vmem>>, vector<512x128xbf16>
    %cst_19 = arith.constant dense<0.000000e+00> : vector<16x128xf32>
    %22 = tpu.matmul %20, %21, %cst_19 {dimension_numbers = #tpu.dot_dimension_numbers<[1], [0], [0], [1], [0, 0, 1, 1], [], []>} : vector<16x512xbf16>, vector<512x128xbf16>, vector<16x128xf32> -> vector<16x128xf32>
    %c0_20 = arith.constant 0 : index
    %c0_21 = arith.constant 0 : index
    %23 = vector.load %arg9[%c0_20, %c0_21] : memref<1x128xf32, #tpu.memory_space<vmem>>, vector<1x128xf32>
    %24 = vector.broadcast %23 : vector<1x128xf32> to vector<16x128xf32>
    %25 = arith.addf %22, %24 : vector<16x128xf32>
    %26 = arith.negf %25 : vector<16x128xf32>
    %27 = math.exp %26 : vector<16x128xf32>
    %cst_22 = arith.constant 1.000000e+00 : f32
    %28 = vector.broadcast %cst_22 : f32 to vector<16x128xf32>
    %29 = arith.addf %28, %27 : vector<16x128xf32>
    %30 = arith.divf %28, %29 : vector<16x128xf32>
    %c0_23 = arith.constant 0 : index
    %c0_24 = arith.constant 0 : index
    %31 = vector.load %arg10[%c0_23, %c0_24] : memref<16x128xf32, #tpu.memory_space<vmem>>, vector<16x128xf32>
    tpu.vector_store %arg10[%c0_23, %c0_24], %30 {strides = array<i32>} : memref<16x128xf32, #tpu.memory_space<vmem>>, vector<16x128xf32>,
    return
  }
  func.func @transform_0(%arg0: i32) -> (i32, i32) {
    %c0_i32 = arith.constant 0 : i32
    %c0_i32_0 = arith.constant 0 : i32
    return %arg0, %c0_i32 : i32, i32
  }
  func.func @transform_1(%arg0: i32) -> (i32, i32) {
    %c0_i32 = arith.constant 0 : i32
    %c0_i32_0 = arith.constant 0 : i32
    return %arg0, %c0_i32 : i32, i32
  }
  func.func @transform_2(%arg0: i32) -> (i32, i32) {
    %c0_i32 = arith.constant 0 : i32
    %c0_i32_0 = arith.constant 0 : i32
    %c0_i32_1 = arith.constant 0 : i32
    return %c0_i32, %c0_i32_0 : i32, i32
  }
  func.func @transform_3(%arg0: i32) -> (i32, i32) {
    %c0_i32 = arith.constant 0 : i32
    %c0_i32_0 = arith.constant 0 : i32
    %c0_i32_1 = arith.constant 0 : i32
    return %c0_i32, %c0_i32_0 : i32, i32
  }
  func.func @transform_4(%arg0: i32) -> (i32, i32) {
    %c0_i32 = arith.constant 0 : i32
    %c0_i32_0 = arith.constant 0 : i32
    %c0_i32_1 = arith.constant 0 : i32
    return %c0_i32, %c0_i32_0 : i32, i32
  }
  func.func @transform_5(%arg0: i32) -> (i32, i32) {
    %c0_i32 = arith.constant 0 : i32
    %c0_i32_0 = arith.constant 0 : i32
    %c0_i32_1 = arith.constant 0 : i32
    return %c0_i32, %c0_i32_0 : i32, i32
  }
  func.func @transform_6(%arg0: i32) -> (i32, i32) {
    %c0_i32 = arith.constant 0 : i32
    %c0_i32_0 = arith.constant 0 : i32
    %c0_i32_1 = arith.constant 0 : i32
    return %c0_i32, %c0_i32_0 : i32, i32
  }
  func.func @transform_7(%arg0: i32) -> (i32, i32) {
    %c0_i32 = arith.constant 0 : i32
    %c0_i32_0 = arith.constant 0 : i32
    %c0_i32_1 = arith.constant 0 : i32
    return %c0_i32, %c0_i32_0 : i32, i32
  }
  func.func @transform_8(%arg0: i32) -> (i32, i32) {
    %c0_i32 = arith.constant 0 : i32
    %c0_i32_0 = arith.constant 0 : i32
    %c0_i32_1 = arith.constant 0 : i32
    return %c0_i32, %c0_i32_0 : i32, i32
  }
  func.func @transform_9(%arg0: i32) -> (i32, i32) {
    %c0_i32 = arith.constant 0 : i32
    %c0_i32_0 = arith.constant 0 : i32
    return %arg0, %c0_i32 : i32, i32
  }
}

</mosaic_0001>

<bundles_post_ra>
// kernel: tpu_custom_call.1
= control target key start
LH: loop header
LB: loop body
LE: loop exit
PB: predicated region body
PF: predicated region fallthrough
CT: control target
= control target key end

     0   :  { %14 = vsyncpa [#allocation3], 0  ;;  %s4676_s0 = inlined_call_operand.hbm [shape: bf16[16,512], index: 0, kind: input, shape index: {}]   ;;  %s4677_s1 = inlined_call_operand.hbm [shape: bf16[16,384], index: 1, kind: input, shape index: {}]   ;;  %s4678_s2 = inlined_call_operand.hbm [shape: bf16[512,512], index: 2, kind: input, shape index: {}]   ;;  %s4679_s3 = inlined_call_operand.hbm [shape: bf16[384,512], index: 3, kind: input, shape index: {}]   ;;  %s4680_s4 = inlined_call_operand.vmem [shape: f32[1,512], index: 4, kind: input, shape index: {}]   ;;  %s4681_s5 = inlined_call_operand.hbm [shape: bf16[512,512], index: 5, kind: input, shape index: {}]   ;;  %s4682_s6 = inlined_call_operand.vmem [shape: f32[1,512], index: 6, kind: input, shape index: {}]   ;;  %s4683_s7 = inlined_call_operand.hbm [shape: bf16[512,128], index: 7, kind: input, shape index: {}]   ;;  %s4684_s8 = inlined_call_operand.vmem [shape: f32[1,128], index: 8, kind: input, shape index: {}]   ;;  %s4685_s9 = inlined_call_operand.hbm [shape: f32[16,128], index: 9, kind: output, shape index: {}]  }
   0x1   :  { %15 = vsyncpa [#allocation6], 0 }
   0x2   :  { %16 = vsyncpa [#allocation9], 0 }
   0x3   :  { %17 = vsyncpa [#allocation12], 0 }
   0x4   :  { %18 = vsyncpa [#allocation4], 0  ;;  %s4479_s30 = smov [#allocation5]   ;;  %s4315_s13 = scalar_lea.hbm %s4677_s1, 384 }
   0x5   :  { %s36_s10 = sshll.u32 %s4479_s30, 4  ;;  %p4316_p0 = scmp.ne.s32.totalorder %s4677_s1, %s4315_s13  ;;  %s37_s10 = int_to_ptr.vmem [resolvable:$true] %s36_s10 }
   0x6   :  { %p4319_p1 = scmp.lt.u32.totalorder %s4315_s13, %s4677_s1 }
   0x8   :  { %p4321_p2 = pnand %p4319_p1, %p4316_p0 }
   0xa   :  { %4324 = shalt.err (!%p4321_p2)
}
   0xb   :  { %s4325_s18 = scalar_lea.vmem %s37_s10, 384  ;;  %p4330_p4 = scmp.lt.s32.totalorder %s37_s10, %s37_s10 }
   0xc   :  { %p4326_p3 = scmp.ne.s32.totalorder %s37_s10, %s4325_s18  ;;  %p4331_p5 = scmp.lt.s32.totalorder %s4325_s18, %s4325_s18 }
   0xe   :  { %p4332_p6 = por %p4331_p5, %p4330_p4 }
  0x10   :  { %p4333_p7 = pnand %p4332_p6, %p4326_p3 }
  0x12   :  { %4336 = shalt.err (!%p4333_p7)
}
  0x13   :  { %s4480_s19 = smov 192   ;;  %s4481_s20 = smov 12  }
  0x14   :  { %42 = dma.hbm_to_vmem [thread:$0]  %s4677_s1, 384, %s37_s10, [#allocation6], %s4480_s19, %s4480_s19, %s4481_s20  }
  0x15   :  { %s4482_s23 = smov [#allocation8]   ;;  %s4483_s25 = smov [#allocation2]  }
  0x16   :  { %s60_s24 = sshll.u32 %s4482_s23, 4  ;;  %s24_s26 = sshll.u32 %s4483_s25, 4  ;;  %s61_s24 = int_to_ptr.vmem [resolvable:$true] %s60_s24  ;;  %s25_s26 = int_to_ptr.vmem [resolvable:$true] %s24_s26 }
  0x17   :  { %s4337_s29 = scalar_lea.hbm %s4679_s3, 12288 }
  0x18   :  { %p4338_p8 = scmp.ne.s32.totalorder %s4679_s3, %s4337_s29  ;;  %p4341_p9 = scmp.lt.u32.totalorder %s4337_s29, %s4679_s3 }
  0x1a   :  { %p4343_p10 = pnand %p4341_p9, %p4338_p8 }
  0x1c   :  { %4346 = shalt.err (!%p4343_p10)
}
  0x1d   :  { %s4347_s1 = scalar_lea.vmem %s61_s24, 12288  ;;  %p4352_p12 = scmp.lt.s32.totalorder %s61_s24, %s61_s24 }
  0x1e   :  { %p4348_p11 = scmp.ne.s32.totalorder %s61_s24, %s4347_s1  ;;  %p4353_p13 = scmp.lt.s32.totalorder %s4347_s1, %s4347_s1 }
  0x20   :  { %p4354_p0 = por %p4353_p13, %p4352_p12 }
  0x22   :  { %p4355_p1 = pnand %p4354_p0, %p4348_p11 }
  0x24   :  { %4358 = shalt.err (!%p4355_p1)
}
  0x25   :  { %s4484_s10 = smov 256   ;;  %s4485_s14 = smov 16  }
  0x26   :  { %66 = dma.hbm_to_vmem [thread:$0]  %s4679_s3, 12288, %s61_s24, [#allocation9], %s4484_s10, %s4484_s10, %s4485_s14  }
  0x27   :  { %s4359_s19 = scalar_lea.hbm %s4676_s0, 512 }
  0x28   :  { %p4360_p2 = scmp.ne.s32.totalorder %s4676_s0, %s4359_s19  ;;  %p4363_p3 = scmp.lt.u32.totalorder %s4359_s19, %s4676_s0 }
  0x2a   :  { %p4365_p4 = pnand %p4363_p3, %p4360_p2 }
  0x2c   :  { %4368 = shalt.err (!%p4365_p4)
}
  0x2d   :  { %s4369_s25 = scalar_lea.vmem %s25_s26, 512  ;;  %p4374_p6 = scmp.lt.s32.totalorder %s25_s26, %s25_s26 }
  0x2e   :  { %p4370_p5 = scmp.ne.s32.totalorder %s25_s26, %s4369_s25  ;;  %p4375_p7 = scmp.lt.s32.totalorder %s4369_s25, %s4369_s25 }
  0x30   :  { %p4376_p8 = por %p4375_p7, %p4374_p6 }
  0x32   :  { %p4377_p9 = pnand %p4376_p8, %p4370_p5 }
  0x34   :  { %4380 = shalt.err (!%p4377_p9)
}
  0x35   :  { %30 = dma.hbm_to_vmem [thread:$0]  %s4676_s0, 512, %s25_s26, [#allocation3], %s4484_s10, %s4484_s10, %s4485_s14  }
  0x36   :  { %s4486_s27 = smov [#allocation7]   ;;  %s4487_s29 = smov [#allocation10]  }
  0x37   :  { %s48_s28 = sshll.u32 %s4486_s27, 4  ;;  %s74_s30 = sshll.u32 %s4487_s29, 4  ;;  %s49_s28 = int_to_ptr.vmem [resolvable:$true] %s48_s28  ;;  %s75_s30 = int_to_ptr.vmem [resolvable:$true] %s74_s30 }
  0x38   :  { %s4381_s13 = scalar_lea.hbm %s4678_s2, 16384 }
  0x39   :  { %p4382_p10 = scmp.ne.s32.totalorder %s4678_s2, %s4381_s13  ;;  %p4385_p11 = scmp.lt.u32.totalorder %s4381_s13, %s4678_s2 }
  0x3b   :  { %p4387_p12 = pnand %p4385_p11, %p4382_p10 }
  0x3d   :  { %4390 = shalt.err (!%p4387_p12)
}
  0x3e   :  { %s4391_s0 = scalar_lea.vmem %s49_s28, 16384  ;;  %p4396_p0 = scmp.lt.s32.totalorder %s49_s28, %s49_s28 }
  0x3f   :  { %p4392_p13 = scmp.ne.s32.totalorder %s49_s28, %s4391_s0  ;;  %p4397_p1 = scmp.lt.s32.totalorder %s4391_s0, %s4391_s0 }
  0x41   :  { %p4398_p2 = por %p4397_p1, %p4396_p0 }
  0x43   :  { %p4399_p3 = pnand %p4398_p2, %p4392_p13 }
  0x45   :  { %4402 = shalt.err (!%p4399_p3)
}
  0x46   :  { %54 = dma.hbm_to_vmem [thread:$0]  %s4678_s2, 16384, %s49_s28, [#allocation6], %s4484_s10, %s4484_s10, %s4485_s14  }
  0x47   :  { %s4403_s21 = scalar_lea.hbm %s4681_s5, 16384 }
  0x48   :  { %p4404_p4 = scmp.ne.s32.totalorder %s4681_s5, %s4403_s21  ;;  %p4407_p5 = scmp.lt.u32.totalorder %s4403_s21, %s4681_s5 }
  0x4a   :  { %p4409_p6 = pnand %p4407_p5, %p4404_p4 }
  0x4c   :  { %4412 = shalt.err (!%p4409_p6)
}
  0x4d   :  { %s4413_s24 = scalar_lea.vmem %s75_s30, 16384  ;;  %p4418_p8 = scmp.lt.s32.totalorder %s75_s30, %s75_s30 }
  0x4e   :  { %p4414_p7 = scmp.ne.s32.totalorder %s75_s30, %s4413_s24  ;;  %p4419_p9 = scmp.lt.s32.totalorder %s4413_s24, %s4413_s24 }
  0x50   :  { %p4420_p10 = por %p4419_p9, %p4418_p8 }
  0x52   :  { %p4421_p11 = pnand %p4420_p10, %p4414_p7 }
  0x54   :  { %4424 = shalt.err (!%p4421_p11)
}
  0x55   :  { %80 = dma.hbm_to_vmem [thread:$0]  %s4681_s5, 16384, %s75_s30, [#allocation9], %s4484_s10, %s4484_s10, %s4485_s14  }
  0x56   :  { %s4488_s28 = smov [#allocation11]   ;;  %s4425_s13 = scalar_lea.hbm %s4683_s7, 4096 }
  0x57   :  { %s88_s29 = sshll.u32 %s4488_s28, 4  ;;  %p4426_p12 = scmp.ne.s32.totalorder %s4683_s7, %s4425_s13  ;;  %s89_s29 = int_to_ptr.vmem [resolvable:$true] %s88_s29 }
  0x58   :  { %p4429_p13 = scmp.lt.u32.totalorder %s4425_s13, %s4683_s7 }
  0x5a   :  { %p4431_p0 = pnand %p4429_p13, %p4426_p12 }
  0x5c   :  { %4434 = shalt.err (!%p4431_p0)
}
  0x5d   :  { %s4435_s0 = scalar_lea.vmem %s89_s29, 4096  ;;  %p4440_p2 = scmp.lt.s32.totalorder %s89_s29, %s89_s29 }
  0x5e   :  { %p4436_p1 = scmp.ne.s32.totalorder %s89_s29, %s4435_s0  ;;  %p4441_p3 = scmp.lt.s32.totalorder %s4435_s0, %s4435_s0 }
  0x60   :  { %p4442_p4 = por %p4441_p3, %p4440_p2 }
  0x62   :  { %p4443_p5 = pnand %p4442_p4, %p4436_p1 }
  0x64   :  { %4446 = shalt.err (!%p4443_p5)
}
  0x65   :  { %s4489_s5 = smov 64   ;;  %s4490_s10 = smov 4  }
  0x66   :  { %94 = dma.hbm_to_vmem [thread:$0]  %s4683_s7, 4096, %s89_s29, [#allocation12], %s4489_s5, %s4489_s5, %s4490_s10  }
  0x67   :  { %4469 = dma.done.wait [#allocation3], 512  }
  0x68   :  { %4470 = vsyncadd [#allocation3], 4294966784 }
  0x69   :  { %4471 = dma.done.wait [#allocation6], 16768  }
  0x6a   :  { %4472 = vsyncadd [#allocation6], 4294950528 }
  0x6b   :  { %4473 = dma.done.wait [#allocation9], 28672  }
  0x6c   :  { %4474 = vsyncadd [#allocation9], 4294938624 }
  0x6d   :  { %4475 = dma.done.wait [#allocation12], 4096  }
  0x6e   :  { %4476 = vsyncadd [#allocation12], 4294963200  ;;  %v3737_v0 = vld [vmem:[#allocation8 + $0x4] ss:$16 sps:$4 sm:$0xff]   ;;  %v3739_v1 = vld [vmem:[#allocation8 + $0xc] ss:$16 sps:$4 sm:$0xff]  }
  0x6f   :  { %844 = vmatprep.subr.bf16.mxu0 %v3737_v0  ;;  %v3741_v2 = vld [vmem:[#allocation8] ss:$16 sps:$4 sm:$0xff]   ;;  %v3742_v3 = vld [vmem:[#allocation8 + $0x8] ss:$16 sps:$4 sm:$0xff]   ;;  %930 = vmatprep.subr.bf16.mxu1 %v3739_v1  ;;  %v3743_v4 = vld [vmem:[#allocation8 + $0x24] ss:$16 sps:$4 sm:$0xff]  }
  0x70   :  { %845 = vmatpush1.bf16.msra.mxu0 %v3741_v2  ;;  %931 = vmatpush1.bf16.msra.mxu1 %v3742_v3  ;;  %v3745_v5 = vld [vmem:[#allocation8 + $0x2c] ss:$16 sps:$4 sm:$0xff]   ;;  %v3747_v6 = vld [vmem:[#allocation8 + $0x20] ss:$16 sps:$4 sm:$0xff]   ;;  %v3748_v7 = vld [vmem:[#allocation8 + $0x28] ss:$16 sps:$4 sm:$0xff]  }
  0x71   :  { %846 = vmatprep.subr.bf16.mxu0 %v3743_v4  ;;  %932 = vmatprep.subr.bf16.mxu1 %v3745_v5  ;;  %v3749_v8 = vld [vmem:[#allocation8 + $0x44] ss:$16 sps:$4 sm:$0xff]   ;;  %v3751_v9 = vld [vmem:[#allocation8 + $0x4c] ss:$16 sps:$4 sm:$0xff]   ;;  %v3753_v10 = vld [vmem:[#allocation8 + $0x40] ss:$16 sps:$4 sm:$0xff]  }
  0x72   :  { %v3754_v11 = vld [vmem:[#allocation8 + $0x48] ss:$16 sps:$4 sm:$0xff]   ;;  %v3755_v12 = vld [vmem:[#allocation8 + $0x64] ss:$16 sps:$4 sm:$0xff]   ;;  %v3757_v13 = vld [vmem:[#allocation8 + $0x6c] ss:$16 sps:$4 sm:$0xff]  }
  0x73   :  { %v3759_v14 = vld [vmem:[#allocation8 + $0x60] ss:$16 sps:$4 sm:$0xff]   ;;  %v3760_v15 = vld [vmem:[#allocation8 + $0x68] ss:$16 sps:$4 sm:$0xff]   ;;  %v3761_v16 = vld [vmem:[#allocation8 + $0x84] ss:$16 sps:$4 sm:$0xff]  }
  0x74   :  { %847 = vmatpush1.bf16.msra.mxu0 %v3747_v6  ;;  %933 = vmatpush1.bf16.msra.mxu1 %v3748_v7  ;;  %v3763_v17 = vld [vmem:[#allocation8 + $0x8c] ss:$16 sps:$4 sm:$0xff]   ;;  %v3765_v18 = vld [vmem:[#allocation8 + $0x80] ss:$16 sps:$4 sm:$0xff]   ;;  %v3766_v19 = vld [vmem:[#allocation8 + $0x88] ss:$16 sps:$4 sm:$0xff]  }
  0x75   :  { %848 = vmatprep.subr.bf16.mxu0 %v3749_v8  ;;  %934 = vmatprep.subr.bf16.mxu1 %v3751_v9  ;;  %v3767_v20 = vld [vmem:[#allocation8 + $0xa4] ss:$16 sps:$4 sm:$0xff]   ;;  %v3769_v21 = vld [vmem:[#allocation8 + $0xac] ss:$16 sps:$4 sm:$0xff]   ;;  %v3771_v22 = vld [vmem:[#allocation8 + $0xa0] ss:$16 sps:$4 sm:$0xff]  }
  0x76   :  { %v3772_v23 = vld [vmem:[#allocation8 + $0xa8] ss:$16 sps:$4 sm:$0xff]   ;;  %v3773_v24 = vld [vmem:[#allocation8 + $0xc4] ss:$16 sps:$4 sm:$0xff]   ;;  %v3775_v25 = vld [vmem:[#allocation8 + $0xcc] ss:$16 sps:$4 sm:$0xff]  }
  0x77   :  { %v3777_v26 = vld [vmem:[#allocation8 + $0xc0] ss:$16 sps:$4 sm:$0xff]   ;;  %v3778_v27 = vld [vmem:[#allocation8 + $0xc8] ss:$16 sps:$4 sm:$0xff]   ;;  %v3779_v28 = vld [vmem:[#allocation8 + $0xe4] ss:$16 sps:$4 sm:$0xff]  }
  0x78   :  { %849 = vmatpush1.bf16.msra.mxu0 %v3753_v10  ;;  %935 = vmatpush1.bf16.msra.mxu1 %v3754_v11  ;;  %v3781_v29 = vld [vmem:[#allocation8 + $0xec] ss:$16 sps:$4 sm:$0xff]   ;;  %v3783_v30 = vld [vmem:[#allocation8 + $0xe0] ss:$16 sps:$4 sm:$0xff]   ;;  %v3784_v31 = vld [vmem:[#allocation8 + $0xe8] ss:$16 sps:$4 sm:$0xff]  }
  0x79   :  { %850 = vmatprep.subr.bf16.mxu0 %v3755_v12  ;;  %936 = vmatprep.subr.bf16.mxu1 %v3757_v13  ;;  %v3785_v32 = vld [vmem:[#allocation8 + $0x104] ss:$16 sps:$4 sm:$0xff]   ;;  %v3787_v33 = vld [vmem:[#allocation8 + $0x10c] ss:$16 sps:$4 sm:$0xff]   ;;  %v3789_v34 = vld [vmem:[#allocation8 + $0x100] ss:$16 sps:$4 sm:$0xff]  }
  0x7a   :  { %v3790_v35 = vld [vmem:[#allocation8 + $0x108] ss:$16 sps:$4 sm:$0xff]   ;;  %v3791_v36 = vld [vmem:[#allocation8 + $0x124] ss:$16 sps:$4 sm:$0xff]   ;;  %v3793_v37 = vld [vmem:[#allocation8 + $0x12c] ss:$16 sps:$4 sm:$0xff]  }
  0x7b   :  { %v3795_v38 = vld [vmem:[#allocation8 + $0x120] ss:$16 sps:$4 sm:$0xff]   ;;  %v3796_v39 = vld [vmem:[#allocation8 + $0x128] ss:$16 sps:$4 sm:$0xff]   ;;  %v3797_v40 = vld [vmem:[#allocation8 + $0x144] ss:$16 sps:$4 sm:$0xff]  }
  0x7c   :  { %851 = vmatpush1.bf16.msra.mxu0 %v3759_v14  ;;  %937 = vmatpush1.bf16.msra.mxu1 %v3760_v15  ;;  %v3799_v41 = vld [vmem:[#allocation8 + $0x14c] ss:$16 sps:$4 sm:$0xff]   ;;  %v3801_v42 = vld [vmem:[#allocation8 + $0x140] ss:$16 sps:$4 sm:$0xff]   ;;  %v3802_v43 = vld [vmem:[#allocation8 + $0x148] ss:$16 sps:$4 sm:$0xff]  }
  0x7d   :  { %852 = vmatprep.subr.bf16.mxu0 %v3761_v16  ;;  %938 = vmatprep.subr.bf16.mxu1 %v3763_v17  ;;  %v3803_v44 = vld [vmem:[#allocation8 + $0x164] ss:$16 sps:$4 sm:$0xff]   ;;  %v3805_v45 = vld [vmem:[#allocation8 + $0x16c] ss:$16 sps:$4 sm:$0xff]   ;;  %v3807_v46 = vld [vmem:[#allocation8 + $0x160] ss:$16 sps:$4 sm:$0xff]  }
  0x7e   :  { %v3808_v47 = vld [vmem:[#allocation8 + $0x168] ss:$16 sps:$4 sm:$0xff]   ;;  %v3809_v49 = vld [vmem:[#allocation8 + $0x184] ss:$16 sps:$4 sm:$0xff]   ;;  %v3811_v50 = vld [vmem:[#allocation8 + $0x18c] ss:$16 sps:$4 sm:$0xff]  }
  0x7f   :  { %v3835_v48 = vld [vmem:[#allocation5 + $0x4] ss:$12 sps:$4 sm:$0xff]   ;;  %v3813_v51 = vld [vmem:[#allocation8 + $0x180] ss:$16 sps:$4 sm:$0xff]   ;;  %v3815_v53 = vld [vmem:[#allocation8 + $0x1a4] ss:$16 sps:$4 sm:$0xff]  }
  0x80   :  { %853 = vmatpush1.bf16.msra.mxu0 %v3765_v18  ;;  %939 = vmatpush1.bf16.msra.mxu1 %v3766_v19  ;;  %v3814_v52 = vld [vmem:[#allocation8 + $0x188] ss:$16 sps:$4 sm:$0xff]   ;;  %v3817_v54 = vld [vmem:[#allocation8 + $0x1ac] ss:$16 sps:$4 sm:$0xff]   ;;  %v3819_v55 = vld [vmem:[#allocation8 + $0x1a0] ss:$16 sps:$4 sm:$0xff]  }
  0x81   :  { %854 = vmatprep.subr.bf16.mxu0 %v3767_v20  ;;  %940 = vmatprep.subr.bf16.mxu1 %v3769_v21  ;;  %v3820_v56 = vld [vmem:[#allocation8 + $0x1a8] ss:$16 sps:$4 sm:$0xff]   ;;  %v3821_v57 = vld [vmem:[#allocation8 + $0x1c4] ss:$16 sps:$4 sm:$0xff]   ;;  %v3823_v58 = vld [vmem:[#allocation8 + $0x1cc] ss:$16 sps:$4 sm:$0xff]  }
  0x82   :  { %876 = vmatprep.mubr.bf16.mxu0 %v3835_v48  ;;  %962 = vmatprep.mubr.bf16.mxu1 %v3835_v48  ;;  %v3825_v59 = vld [vmem:[#allocation8 + $0x1c0] ss:$16 sps:$4 sm:$0xff]   ;;  %v3826_v60 = vld [vmem:[#allocation8 + $0x1c8] ss:$16 sps:$4 sm:$0xff]   ;;  %v3827_v61 = vld [vmem:[#allocation8 + $0x1e4] ss:$16 sps:$4 sm:$0xff]  }
  0x83   :  { %v3829_v62 = vld [vmem:[#allocation8 + $0x1ec] ss:$16 sps:$4 sm:$0xff]   ;;  %v3831_v63 = vld [vmem:[#allocation8 + $0x1e0] ss:$16 sps:$4 sm:$0xff]   ;;  %v3832_v0 = vld [vmem:[#allocation8 + $0x1e8] ss:$16 sps:$4 sm:$0xff]  }
  0x84   :  { %855 = vmatpush1.bf16.msra.mxu0 %v3771_v22  ;;  %941 = vmatpush1.bf16.msra.mxu1 %v3772_v23  ;;  %v3838_v1 = vld [vmem:[#allocation8 + $0x204] ss:$16 sps:$4 sm:$0xff]   ;;  %v3841_v2 = vld [vmem:[#allocation8 + $0x20c] ss:$16 sps:$4 sm:$0xff]   ;;  %v3836_v4 = vld [vmem:[#allocation8 + $0x200] ss:$16 sps:$4 sm:$0xff]  }
  0x85   :  { %856 = vmatprep.subr.bf16.mxu0 %v3773_v24  ;;  %942 = vmatprep.subr.bf16.mxu1 %v3775_v25  ;;  %v3833_v3 = vld [vmem:[#allocation5] ss:$12 sps:$4 sm:$0xff]   ;;  %v3847_v7 = vld [vmem:[#allocation8 + $0x22c] ss:$16 sps:$4 sm:$0xff]   ;;  %v3842_v8 = vld [vmem:[#allocation8 + $0x220] ss:$16 sps:$4 sm:$0xff]  }
  0x86   :  { %v3839_v5 = vld [vmem:[#allocation8 + $0x208] ss:$16 sps:$4 sm:$0xff]   ;;  %v3844_v6 = vld [vmem:[#allocation8 + $0x224] ss:$16 sps:$4 sm:$0xff]   ;;  %v3853_v11 = vld [vmem:[#allocation8 + $0x24c] ss:$16 sps:$4 sm:$0xff]  }
  0x87   :  { %v3845_v9 = vld [vmem:[#allocation8 + $0x228] ss:$16 sps:$4 sm:$0xff]   ;;  %v3850_v10 = vld [vmem:[#allocation8 + $0x244] ss:$16 sps:$4 sm:$0xff]   ;;  %v4491_v12 = vmov 0  }
  0x88   :  { %857 = vmatpush1.bf16.msra.mxu0 %v3777_v26  ;;  %943 = vmatpush1.bf16.msra.mxu1 %v3778_v27  ;;  %v3848_v13 = vld [vmem:[#allocation8 + $0x240] ss:$16 sps:$4 sm:$0xff]   ;;  %v3851_v14 = vld [vmem:[#allocation8 + $0x248] ss:$16 sps:$4 sm:$0xff]   ;;  %v3856_v15 = vld [vmem:[#allocation8 + $0x264] ss:$16 sps:$4 sm:$0xff]  }
  0x89   :  { %858 = vmatprep.subr.bf16.mxu0 %v3779_v28  ;;  %944 = vmatprep.subr.bf16.mxu1 %v3781_v29  ;;  %v3859_v16 = vld [vmem:[#allocation8 + $0x26c] ss:$16 sps:$4 sm:$0xff]   ;;  %v3854_v17 = vld [vmem:[#allocation8 + $0x260] ss:$16 sps:$4 sm:$0xff]   ;;  %v3857_v18 = vld [vmem:[#allocation8 + $0x268] ss:$16 sps:$4 sm:$0xff]  }
  0x8a   :  { %v3862_v19 = vld [vmem:[#allocation8 + $0x284] ss:$16 sps:$4 sm:$0xff]   ;;  %v3865_v20 = vld [vmem:[#allocation8 + $0x28c] ss:$16 sps:$4 sm:$0xff]   ;;  %v3860_v21 = vld [vmem:[#allocation8 + $0x280] ss:$16 sps:$4 sm:$0xff]  }
  0x8b   :  { %v3863_v22 = vld [vmem:[#allocation8 + $0x288] ss:$16 sps:$4 sm:$0xff]   ;;  %v3868_v23 = vld [vmem:[#allocation8 + $0x2a4] ss:$16 sps:$4 sm:$0xff]   ;;  %v3871_v24 = vld [vmem:[#allocation8 + $0x2ac] ss:$16 sps:$4 sm:$0xff]  }
  0x8c   :  { %859 = vmatpush1.bf16.msra.mxu0 %v3783_v30  ;;  %945 = vmatpush1.bf16.msra.mxu1 %v3784_v31  ;;  %v3866_v25 = vld [vmem:[#allocation8 + $0x2a0] ss:$16 sps:$4 sm:$0xff]   ;;  %v3869_v26 = vld [vmem:[#allocation8 + $0x2a8] ss:$16 sps:$4 sm:$0xff]   ;;  %v3874_v27 = vld [vmem:[#allocation8 + $0x2c4] ss:$16 sps:$4 sm:$0xff]  }
  0x8d   :  { %860 = vmatprep.subr.bf16.mxu0 %v3785_v32  ;;  %946 = vmatprep.subr.bf16.mxu1 %v3787_v33  ;;  %v3877_v28 = vld [vmem:[#allocation8 + $0x2cc] ss:$16 sps:$4 sm:$0xff]   ;;  %v3872_v29 = vld [vmem:[#allocation8 + $0x2c0] ss:$16 sps:$4 sm:$0xff]   ;;  %v3875_v30 = vld [vmem:[#allocation8 + $0x2c8] ss:$16 sps:$4 sm:$0xff]  }
  0x8e   :  { %v3880_v31 = vld [vmem:[#allocation8 + $0x2e4] ss:$16 sps:$4 sm:$0xff]   ;;  %v3883_v32 = vld [vmem:[#allocation8 + $0x2ec] ss:$16 sps:$4 sm:$0xff]   ;;  %v3878_v33 = vld [vmem:[#allocation8 + $0x2e0] ss:$16 sps:$4 sm:$0xff]  }
  0x8f   :  { %v3905_v48 = vld [vmem:[#allocation7 + $0x64] ss:$16 sps:$4 sm:$0xff]  }
  0x90   :  { %861 = vmatpush1.bf16.msra.mxu0 %v3789_v34  ;;  %947 = vmatpush1.bf16.msra.mxu1 %v3790_v35  ;;  %v3881_v34 = vld [vmem:[#allocation8 + $0x2e8] ss:$16 sps:$4 sm:$0xff]   ;;  %v3886_v35 = vld [vmem:[#allocation7 + $0x4] ss:$16 sps:$4 sm:$0xff]  }
  0x91   :  { %862 = vmatprep.subr.bf16.mxu0 %v3791_v36  ;;  %948 = vmatprep.subr.bf16.mxu1 %v3793_v37  ;;  %v3889_v36 = vld [vmem:[#allocation7 + $0xc] ss:$16 sps:$4 sm:$0xff]   ;;  %v3884_v37 = vld [vmem:[#allocation7] ss:$16 sps:$4 sm:$0xff]  }
  0x94   :  { %863 = vmatpush1.bf16.msra.mxu0 %v3795_v38  ;;  %949 = vmatpush1.bf16.msra.mxu1 %v3796_v39  ;;  %v3890_v38 = vld [vmem:[#allocation5 + $0x8] ss:$12 sps:$4 sm:$0xff]   ;;  %v3887_v39 = vld [vmem:[#allocation7 + $0x8] ss:$16 sps:$4 sm:$0xff]  }
  0x95   :  { %864 = vmatprep.subr.bf16.mxu0 %v3797_v40  ;;  %950 = vmatprep.subr.bf16.mxu1 %v3799_v41  ;;  %v3893_v40 = vld [vmem:[#allocation7 + $0x24] ss:$16 sps:$4 sm:$0xff]   ;;  %v3896_v41 = vld [vmem:[#allocation7 + $0x2c] ss:$16 sps:$4 sm:$0xff]  }
  0x98   :  { %865 = vmatpush1.bf16.msra.mxu0 %v3801_v42  ;;  %951 = vmatpush1.bf16.msra.mxu1 %v3802_v43  ;;  %v3891_v42 = vld [vmem:[#allocation7 + $0x20] ss:$16 sps:$4 sm:$0xff]   ;;  %v3894_v43 = vld [vmem:[#allocation7 + $0x28] ss:$16 sps:$4 sm:$0xff]  }
  0x99   :  { %866 = vmatprep.subr.bf16.mxu0 %v3803_v44  ;;  %952 = vmatprep.subr.bf16.mxu1 %v3805_v45  ;;  %v3899_v44 = vld [vmem:[#allocation7 + $0x44] ss:$16 sps:$4 sm:$0xff]   ;;  %v3902_v45 = vld [vmem:[#allocation7 + $0x4c] ss:$16 sps:$4 sm:$0xff]  }
  0x9c   :  { %867 = vmatpush1.bf16.msra.mxu0 %v3807_v46  ;;  %953 = vmatpush1.bf16.msra.mxu1 %v3808_v47  ;;  %v3897_v46 = vld [vmem:[#allocation7 + $0x40] ss:$16 sps:$4 sm:$0xff]   ;;  %v3900_v47 = vld [vmem:[#allocation7 + $0x48] ss:$16 sps:$4 sm:$0xff]  }
  0x9d   :  { %868 = vmatprep.subr.bf16.mxu0 %v3809_v49  ;;  %954 = vmatprep.subr.bf16.mxu1 %v3811_v50  ;;  %v3908_v49 = vld [vmem:[#allocation7 + $0x6c] ss:$16 sps:$4 sm:$0xff]   ;;  %v3903_v50 = vld [vmem:[#allocation7 + $0x60] ss:$16 sps:$4 sm:$0xff]  }
  0xa0   :  { %869 = vmatpush1.bf16.msra.mxu0 %v3813_v51  ;;  %955 = vmatpush1.bf16.msra.mxu1 %v3814_v52  ;;  %v3906_v51 = vld [vmem:[#allocation7 + $0x68] ss:$16 sps:$4 sm:$0xff]   ;;  %v3911_v52 = vld [vmem:[#allocation7 + $0x84] ss:$16 sps:$4 sm:$0xff]  }
  0xa1   :  { %870 = vmatprep.subr.bf16.mxu0 %v3815_v53  ;;  %956 = vmatprep.subr.bf16.mxu1 %v3817_v54  ;;  %v3914_v53 = vld [vmem:[#allocation7 + $0x8c] ss:$16 sps:$4 sm:$0xff]  }
  0xa2   :  { %v3983_v54 = vld [vmem:[#allocation2 + $0x4] ss:$16 sps:$4 sm:$0xff]  }
  0xa4   :  { %871 = vmatpush1.bf16.msra.mxu0 %v3819_v55  ;;  %957 = vmatpush1.bf16.msra.mxu1 %v3820_v56  ;;  %v3909_v55 = vld [vmem:[#allocation7 + $0x80] ss:$16 sps:$4 sm:$0xff]   ;;  %v3912_v56 = vld [vmem:[#allocation7 + $0x88] ss:$16 sps:$4 sm:$0xff]  }
  0xa5   :  { %872 = vmatprep.subr.bf16.mxu0 %v3821_v57  ;;  %958 = vmatprep.subr.bf16.mxu1 %v3823_v58  ;;  %v3917_v57 = vld [vmem:[#allocation7 + $0xa4] ss:$16 sps:$4 sm:$0xff]   ;;  %v3920_v58 = vld [vmem:[#allocation7 + $0xac] ss:$16 sps:$4 sm:$0xff]  }
  0xa8   :  { %873 = vmatpush1.bf16.msra.mxu0 %v3825_v59  ;;  %959 = vmatpush1.bf16.msra.mxu1 %v3826_v60  ;;  %v3915_v59 = vld [vmem:[#allocation7 + $0xa0] ss:$16 sps:$4 sm:$0xff]   ;;  %v3918_v60 = vld [vmem:[#allocation7 + $0xa8] ss:$16 sps:$4 sm:$0xff]  }
  0xa9   :  { %874 = vmatprep.subr.bf16.mxu0 %v3827_v61  ;;  %960 = vmatprep.subr.bf16.mxu1 %v3829_v62  ;;  %v3923_v61 = vld [vmem:[#allocation7 + $0xc4] ss:$16 sps:$4 sm:$0xff]   ;;  %v3926_v62 = vld [vmem:[#allocation7 + $0xcc] ss:$16 sps:$4 sm:$0xff]  }
  0xac   :  { %875 = vmatpush1.bf16.msra.mxu0 %v3831_v63  ;;  %961 = vmatpush1.bf16.msra.mxu1 %v3832_v0  ;;  %v3921_v63 = vld [vmem:[#allocation7 + $0xc0] ss:$16 sps:$4 sm:$0xff]   ;;  %v3924_v0 = vld [vmem:[#allocation7 + $0xc8] ss:$16 sps:$4 sm:$0xff]  }
  0xad   :  { %887 = vmatprep.subr.bf16.mxu0 %v3838_v1  ;;  %973 = vmatprep.subr.bf16.mxu1 %v3841_v2  ;;  %v3929_v1 = vld [vmem:[#allocation7 + $0xe4] ss:$16 sps:$4 sm:$0xff]   ;;  %v3932_v2 = vld [vmem:[#allocation7 + $0xec] ss:$16 sps:$4 sm:$0xff]  }
  0xaf   :  { %877 = vmatmul.mubr.bf16.vlgmr.msra.gmra.mrb[0].mxu0 %v3833_v3  ;;  %963 = vmatmul.mubr.bf16.vlgmr.msra.gmra.mrb[0].mxu1 %v3833_v3  ;;  %v3927_v3 = vld [vmem:[#allocation7 + $0xe0] ss:$16 sps:$4 sm:$0xff]  }
  0xb0   :  { %888 = vmatpush1.bf16.msra.mxu0 %v3836_v4  ;;  %974 = vmatpush1.bf16.msra.mxu1 %v3839_v5  ;;  %v3930_v4 = vld [vmem:[#allocation7 + $0xe8] ss:$16 sps:$4 sm:$0xff]   ;;  %v3935_v5 = vld [vmem:[#allocation7 + $0x104] ss:$16 sps:$4 sm:$0xff]  }
  0xb1   :  { %889 = vmatprep.subr.bf16.mxu0 %v3844_v6  ;;  %975 = vmatprep.subr.bf16.mxu1 %v3847_v7  ;;  %v3938_v6 = vld [vmem:[#allocation7 + $0x10c] ss:$16 sps:$4 sm:$0xff]   ;;  %v3933_v7 = vld [vmem:[#allocation7 + $0x100] ss:$16 sps:$4 sm:$0xff]  }
  0xb2   :  { %919 = vmatprep.mubr.bf16.mxu0 %v4491_v12  ;;  %1005 = vmatprep.mubr.bf16.mxu1 %v4491_v12  ;;  %v3942_v12 = vld [vmem:[#allocation7 + $0x128] ss:$16 sps:$4 sm:$0xff]  }
  0xb4   :  { %890 = vmatpush1.bf16.msra.mxu0 %v3842_v8  ;;  %976 = vmatpush1.bf16.msra.mxu1 %v3845_v9  ;;  %v3936_v8 = vld [vmem:[#allocation7 + $0x108] ss:$16 sps:$4 sm:$0xff]   ;;  %v3941_v9 = vld [vmem:[#allocation7 + $0x124] ss:$16 sps:$4 sm:$0xff]  }
  0xb5   :  { %891 = vmatprep.subr.bf16.mxu0 %v3850_v10  ;;  %977 = vmatprep.subr.bf16.mxu1 %v3853_v11  ;;  %v3944_v10 = vld [vmem:[#allocation7 + $0x12c] ss:$16 sps:$4 sm:$0xff]   ;;  %v3939_v11 = vld [vmem:[#allocation7 + $0x120] ss:$16 sps:$4 sm:$0xff]  }
  0xb8   :  { %892 = vmatpush1.bf16.msra.mxu0 %v3848_v13  ;;  %978 = vmatpush1.bf16.msra.mxu1 %v3851_v14  ;;  %v3947_v13 = vld [vmem:[#allocation7 + $0x144] ss:$16 sps:$4 sm:$0xff]   ;;  %v3950_v14 = vld [vmem:[#allocation7 + $0x14c] ss:$16 sps:$4 sm:$0xff]  }
  0xb9   :  { %893 = vmatprep.subr.bf16.mxu0 %v3856_v15  ;;  %979 = vmatprep.subr.bf16.mxu1 %v3859_v16  ;;  %v3945_v15 = vld [vmem:[#allocation7 + $0x140] ss:$16 sps:$4 sm:$0xff]   ;;  %v3948_v16 = vld [vmem:[#allocation7 + $0x148] ss:$16 sps:$4 sm:$0xff]  }
  0xbc   :  { %894 = vmatpush1.bf16.msra.mxu0 %v3854_v17  ;;  %980 = vmatpush1.bf16.msra.mxu1 %v3857_v18  ;;  %v3953_v17 = vld [vmem:[#allocation7 + $0x164] ss:$16 sps:$4 sm:$0xff]   ;;  %v3956_v18 = vld [vmem:[#allocation7 + $0x16c] ss:$16 sps:$4 sm:$0xff]  }
  0xbd   :  { %895 = vmatprep.subr.bf16.mxu0 %v3862_v19  ;;  %981 = vmatprep.subr.bf16.mxu1 %v3865_v20  ;;  %v3951_v19 = vld [vmem:[#allocation7 + $0x160] ss:$16 sps:$4 sm:$0xff]   ;;  %v3954_v20 = vld [vmem:[#allocation7 + $0x168] ss:$16 sps:$4 sm:$0xff]  }
  0xc0   :  { %896 = vmatpush1.bf16.msra.mxu0 %v3860_v21  ;;  %982 = vmatpush1.bf16.msra.mxu1 %v3863_v22  ;;  %v3959_v21 = vld [vmem:[#allocation7 + $0x184] ss:$16 sps:$4 sm:$0xff]   ;;  %v3962_v22 = vld [vmem:[#allocation7 + $0x18c] ss:$16 sps:$4 sm:$0xff]  }
  0xc1   :  { %897 = vmatprep.subr.bf16.mxu0 %v3868_v23  ;;  %983 = vmatprep.subr.bf16.mxu1 %v3871_v24  ;;  %v3957_v23 = vld [vmem:[#allocation7 + $0x180] ss:$16 sps:$4 sm:$0xff]   ;;  %v3960_v24 = vld [vmem:[#allocation7 + $0x188] ss:$16 sps:$4 sm:$0xff]  }
  0xc4   :  { %898 = vmatpush1.bf16.msra.mxu0 %v3866_v25  ;;  %984 = vmatpush1.bf16.msra.mxu1 %v3869_v26  ;;  %v3965_v25 = vld [vmem:[#allocation7 + $0x1a4] ss:$16 sps:$4 sm:$0xff]   ;;  %v3968_v26 = vld [vmem:[#allocation7 + $0x1ac] ss:$16 sps:$4 sm:$0xff]  }
  0xc5   :  { %899 = vmatprep.subr.bf16.mxu0 %v3874_v27  ;;  %985 = vmatprep.subr.bf16.mxu1 %v3877_v28  ;;  %v3963_v27 = vld [vmem:[#allocation7 + $0x1a0] ss:$16 sps:$4 sm:$0xff]   ;;  %v3966_v28 = vld [vmem:[#allocation7 + $0x1a8] ss:$16 sps:$4 sm:$0xff]  }
  0xc8   :  { %900 = vmatpush1.bf16.msra.mxu0 %v3872_v29  ;;  %986 = vmatpush1.bf16.msra.mxu1 %v3875_v30  ;;  %v3971_v29 = vld [vmem:[#allocation7 + $0x1c4] ss:$16 sps:$4 sm:$0xff]   ;;  %v3974_v30 = vld [vmem:[#allocation7 + $0x1cc] ss:$16 sps:$4 sm:$0xff]  }
  0xc9   :  { %901 = vmatprep.subr.bf16.mxu0 %v3880_v31  ;;  %987 = vmatprep.subr.bf16.mxu1 %v3883_v32  ;;  %v3969_v31 = vld [vmem:[#allocation7 + $0x1c0] ss:$16 sps:$4 sm:$0xff]   ;;  %v3972_v32 = vld [vmem:[#allocation7 + $0x1c8] ss:$16 sps:$4 sm:$0xff]  }
  0xcc   :  { %902 = vmatpush1.bf16.msra.mxu0 %v3878_v33  ;;  %988 = vmatpush1.bf16.msra.mxu1 %v3881_v34  ;;  %v3977_v33 = vld [vmem:[#allocation7 + $0x1e4] ss:$16 sps:$4 sm:$0xff]   ;;  %v3980_v34 = vld [vmem:[#allocation7 + $0x1ec] ss:$16 sps:$4 sm:$0xff]  }
  0xcd   :  { %1676 = vmatprep.subr.bf16.mxu0 %v3886_v35  ;;  %1762 = vmatprep.subr.bf16.mxu1 %v3889_v36  ;;  %v3975_v35 = vld [vmem:[#allocation7 + $0x1e0] ss:$16 sps:$4 sm:$0xff]   ;;  %v3978_v36 = vld [vmem:[#allocation7 + $0x1e8] ss:$16 sps:$4 sm:$0xff]  }
  0xcf   :  { %920 = vmatmul.mubr.bf16.vlgmr.msra.gmra.mrb[0].mxu0 %v3890_v38  ;;  %1006 = vmatmul.mubr.bf16.vlgmr.msra.gmra.mrb[0].mxu1 %v3890_v38  ;;  %v3989_v38 = vld [vmem:[#allocation7 + $0x20c] ss:$16 sps:$4 sm:$0xff]  }
  0xd0   :  { %1677 = vmatpush1.bf16.msra.mxu0 %v3884_v37  ;;  %1763 = vmatpush1.bf16.msra.mxu1 %v3887_v39  ;;  %v3986_v37 = vld [vmem:[#allocation7 + $0x204] ss:$16 sps:$4 sm:$0xff]   ;;  %v3981_v39 = vld [vmem:[#allocation2] ss:$16 sps:$4 sm:$0xff]  }
  0xd1   :  { %1678 = vmatprep.subr.bf16.mxu0 %v3893_v40  ;;  %1764 = vmatprep.subr.bf16.mxu1 %v3896_v41  ;;  %v3984_v40 = vld [vmem:[#allocation7 + $0x200] ss:$16 sps:$4 sm:$0xff]   ;;  %v3987_v41 = vld [vmem:[#allocation7 + $0x208] ss:$16 sps:$4 sm:$0xff]  }
  0xd2   :  { %1708 = vmatprep.mubr.bf16.mxu0 %v3983_v54  ;;  %1794 = vmatprep.mubr.bf16.mxu1 %v3983_v54  ;;  %v4005_v54 = vld [vmem:[#allocation7 + $0x268] ss:$16 sps:$4 sm:$0xff]  }
  0xd4   :  { %1679 = vmatpush1.bf16.msra.mxu0 %v3891_v42  ;;  %1765 = vmatpush1.bf16.msra.mxu1 %v3894_v43  ;;  %v3992_v42 = vld [vmem:[#allocation7 + $0x224] ss:$16 sps:$4 sm:$0xff]   ;;  %v3995_v43 = vld [vmem:[#allocation7 + $0x22c] ss:$16 sps:$4 sm:$0xff]  }
  0xd5   :  { %1680 = vmatprep.subr.bf16.mxu0 %v3899_v44  ;;  %1766 = vmatprep.subr.bf16.mxu1 %v3902_v45  ;;  %v4082_v44 = vld [vmem:[#allocation2 + $0xc] ss:$16 sps:$4 sm:$0xff]   ;;  %v3990_v45 = vld [vmem:[#allocation7 + $0x220] ss:$16 sps:$4 sm:$0xff]  }
  0xd8   :  { %1681 = vmatpush1.bf16.msra.mxu0 %v3897_v46  ;;  %1767 = vmatpush1.bf16.msra.mxu1 %v3900_v47  ;;  %v3993_v46 = vld [vmem:[#allocation7 + $0x228] ss:$16 sps:$4 sm:$0xff]   ;;  %v3998_v47 = vld [vmem:[#allocation7 + $0x244] ss:$16 sps:$4 sm:$0xff]  }
  0xd9   :  { %1682 = vmatprep.subr.bf16.mxu0 %v3905_v48  ;;  %1768 = vmatprep.subr.bf16.mxu1 %v3908_v49  ;;  %v4001_v48 = vld [vmem:[#allocation7 + $0x24c] ss:$16 sps:$4 sm:$0xff]   ;;  %v3996_v49 = vld [vmem:[#allocation7 + $0x240] ss:$16 sps:$4 sm:$0xff]  }
  0xdc   :  { %1683 = vmatpush1.bf16.msra.mxu0 %v3903_v50  ;;  %1769 = vmatpush1.bf16.msra.mxu1 %v3906_v51  ;;  %v3999_v50 = vld [vmem:[#allocation7 + $0x248] ss:$16 sps:$4 sm:$0xff]   ;;  %v4004_v51 = vld [vmem:[#allocation7 + $0x264] ss:$16 sps:$4 sm:$0xff]  }
  0xdd   :  { %1684 = vmatprep.subr.bf16.mxu0 %v3911_v52  ;;  %1770 = vmatprep.subr.bf16.mxu1 %v3914_v53  ;;  %v4007_v52 = vld [vmem:[#allocation7 + $0x26c] ss:$16 sps:$4 sm:$0xff]   ;;  %v4002_v53 = vld [vmem:[#allocation7 + $0x260] ss:$16 sps:$4 sm:$0xff]  }
  0xe0   :  { %1685 = vmatpush1.bf16.msra.mxu0 %v3909_v55  ;;  %1771 = vmatpush1.bf16.msra.mxu1 %v3912_v56  ;;  %v4010_v55 = vld [vmem:[#allocation7 + $0x284] ss:$16 sps:$4 sm:$0xff]   ;;  %v4013_v56 = vld [vmem:[#allocation7 + $0x28c] ss:$16 sps:$4 sm:$0xff]  }
  0xe1   :  { %1686 = vmatprep.subr.bf16.mxu0 %v3917_v57  ;;  %1772 = vmatprep.subr.bf16.mxu1 %v3920_v58  ;;  %v4008_v57 = vld [vmem:[#allocation7 + $0x280] ss:$16 sps:$4 sm:$0xff]   ;;  %v4011_v58 = vld [vmem:[#allocation7 + $0x288] ss:$16 sps:$4 sm:$0xff]  }
  0xe4   :  { %1687 = vmatpush1.bf16.msra.mxu0 %v3915_v59  ;;  %1773 = vmatpush1.bf16.msra.mxu1 %v3918_v60  ;;  %v4016_v59 = vld [vmem:[#allocation7 + $0x2a4] ss:$16 sps:$4 sm:$0xff]   ;;  %v4019_v60 = vld [vmem:[#allocation7 + $0x2ac] ss:$16 sps:$4 sm:$0xff]  }
  0xe5   :  { %1688 = vmatprep.subr.bf16.mxu0 %v3923_v61  ;;  %1774 = vmatprep.subr.bf16.mxu1 %v3926_v62  ;;  %v4014_v61 = vld [vmem:[#allocation7 + $0x2a0] ss:$16 sps:$4 sm:$0xff]   ;;  %v4017_v62 = vld [vmem:[#allocation7 + $0x2a8] ss:$16 sps:$4 sm:$0xff]  }
  0xe8   :  { %1689 = vmatpush1.bf16.msra.mxu0 %v3921_v63  ;;  %1775 = vmatpush1.bf16.msra.mxu1 %v3924_v0  ;;  %v4022_v63 = vld [vmem:[#allocation7 + $0x2c4] ss:$16 sps:$4 sm:$0xff]   ;;  %v4025_v0 = vld [vmem:[#allocation7 + $0x2cc] ss:$16 sps:$4 sm:$0xff]  }
  0xe9   :  { %1690 = vmatprep.subr.bf16.mxu0 %v3929_v1  ;;  %1776 = vmatprep.subr.bf16.mxu1 %v3932_v2  ;;  %v4020_v1 = vld [vmem:[#allocation7 + $0x2c0] ss:$16 sps:$4 sm:$0xff]   ;;  %v4023_v2 = vld [vmem:[#allocation7 + $0x2c8] ss:$16 sps:$4 sm:$0xff]  }
  0xec   :  { %1691 = vmatpush1.bf16.msra.mxu0 %v3927_v3  ;;  %1777 = vmatpush1.bf16.msra.mxu1 %v3930_v4  ;;  %v4028_v3 = vld [vmem:[#allocation7 + $0x2e4] ss:$16 sps:$4 sm:$0xff]   ;;  %v4031_v4 = vld [vmem:[#allocation7 + $0x2ec] ss:$16 sps:$4 sm:$0xff]  }
  0xed   :  { %1692 = vmatprep.subr.bf16.mxu0 %v3935_v5  ;;  %1778 = vmatprep.subr.bf16.mxu1 %v3938_v6  ;;  %v4026_v5 = vld [vmem:[#allocation7 + $0x2e0] ss:$16 sps:$4 sm:$0xff]   ;;  %v4029_v6 = vld [vmem:[#allocation7 + $0x2e8] ss:$16 sps:$4 sm:$0xff]  }
  0xf0   :  { %1693 = vmatpush1.bf16.msra.mxu0 %v3933_v7  ;;  %1779 = vmatpush1.bf16.msra.mxu1 %v3936_v8  ;;  %v4034_v7 = vld [vmem:[#allocation7 + $0x304] ss:$16 sps:$4 sm:$0xff]   ;;  %v4037_v8 = vld [vmem:[#allocation7 + $0x30c] ss:$16 sps:$4 sm:$0xff]  }
  0xf1   :  { %1694 = vmatprep.subr.bf16.mxu0 %v3941_v9  ;;  %1780 = vmatprep.subr.bf16.mxu1 %v3944_v10  ;;  %v4032_v9 = vld [vmem:[#allocation7 + $0x300] ss:$16 sps:$4 sm:$0xff]   ;;  %v4035_v10 = vld [vmem:[#allocation7 + $0x308] ss:$16 sps:$4 sm:$0xff]  }
  0xf4   :  { %1695 = vmatpush1.bf16.msra.mxu0 %v3939_v11  ;;  %1781 = vmatpush1.bf16.msra.mxu1 %v3942_v12  ;;  %v4040_v11 = vld [vmem:[#allocation7 + $0x324] ss:$16 sps:$4 sm:$0xff]   ;;  %v4043_v12 = vld [vmem:[#allocation7 + $0x32c] ss:$16 sps:$4 sm:$0xff]  }
  0xf5   :  { %1696 = vmatprep.subr.bf16.mxu0 %v3947_v13  ;;  %1782 = vmatprep.subr.bf16.mxu1 %v3950_v14  ;;  %v4038_v13 = vld [vmem:[#allocation7 + $0x320] ss:$16 sps:$4 sm:$0xff]   ;;  %v4041_v14 = vld [vmem:[#allocation7 + $0x328] ss:$16 sps:$4 sm:$0xff]  }
  0xf8   :  { %1697 = vmatpush1.bf16.msra.mxu0 %v3945_v15  ;;  %1783 = vmatpush1.bf16.msra.mxu1 %v3948_v16  ;;  %v4046_v15 = vld [vmem:[#allocation7 + $0x344] ss:$16 sps:$4 sm:$0xff]   ;;  %v4049_v16 = vld [vmem:[#allocation7 + $0x34c] ss:$16 sps:$4 sm:$0xff]  }
  0xf9   :  { %1698 = vmatprep.subr.bf16.mxu0 %v3953_v17  ;;  %1784 = vmatprep.subr.bf16.mxu1 %v3956_v18  ;;  %v4044_v17 = vld [vmem:[#allocation7 + $0x340] ss:$16 sps:$4 sm:$0xff]   ;;  %v4047_v18 = vld [vmem:[#allocation7 + $0x348] ss:$16 sps:$4 sm:$0xff]  }
  0xfc   :  { %1699 = vmatpush1.bf16.msra.mxu0 %v3951_v19  ;;  %1785 = vmatpush1.bf16.msra.mxu1 %v3954_v20  ;;  %v4052_v19 = vld [vmem:[#allocation7 + $0x364] ss:$16 sps:$4 sm:$0xff]   ;;  %v4055_v20 = vld [vmem:[#allocation7 + $0x36c] ss:$16 sps:$4 sm:$0xff]  }
  0xfd   :  { %1700 = vmatprep.subr.bf16.mxu0 %v3959_v21  ;;  %1786 = vmatprep.subr.bf16.mxu1 %v3962_v22  ;;  %v4050_v21 = vld [vmem:[#allocation7 + $0x360] ss:$16 sps:$4 sm:$0xff]   ;;  %v4053_v22 = vld [vmem:[#allocation7 + $0x368] ss:$16 sps:$4 sm:$0xff]  }
 0x100   :  { %1701 = vmatpush1.bf16.msra.mxu0 %v3957_v23  ;;  %1787 = vmatpush1.bf16.msra.mxu1 %v3960_v24  ;;  %v4058_v23 = vld [vmem:[#allocation7 + $0x384] ss:$16 sps:$4 sm:$0xff]   ;;  %v4061_v24 = vld [vmem:[#allocation7 + $0x38c] ss:$16 sps:$4 sm:$0xff]  }
 0x101   :  { %1702 = vmatprep.subr.bf16.mxu0 %v3965_v25  ;;  %1788 = vmatprep.subr.bf16.mxu1 %v3968_v26  ;;  %v4056_v25 = vld [vmem:[#allocation7 + $0x380] ss:$16 sps:$4 sm:$0xff]   ;;  %v4059_v26 = vld [vmem:[#allocation7 + $0x388] ss:$16 sps:$4 sm:$0xff]  }
 0x104   :  { %1703 = vmatpush1.bf16.msra.mxu0 %v3963_v27  ;;  %1789 = vmatpush1.bf16.msra.mxu1 %v3966_v28  ;;  %v4064_v27 = vld [vmem:[#allocation7 + $0x3a4] ss:$16 sps:$4 sm:$0xff]   ;;  %v4067_v28 = vld [vmem:[#allocation7 + $0x3ac] ss:$16 sps:$4 sm:$0xff]  }
 0x105   :  { %1704 = vmatprep.subr.bf16.mxu0 %v3971_v29  ;;  %1790 = vmatprep.subr.bf16.mxu1 %v3974_v30  ;;  %v4062_v29 = vld [vmem:[#allocation7 + $0x3a0] ss:$16 sps:$4 sm:$0xff]   ;;  %v4065_v30 = vld [vmem:[#allocation7 + $0x3a8] ss:$16 sps:$4 sm:$0xff]  }
 0x108   :  { %1705 = vmatpush1.bf16.msra.mxu0 %v3969_v31  ;;  %1791 = vmatpush1.bf16.msra.mxu1 %v3972_v32  ;;  %v4070_v31 = vld [vmem:[#allocation7 + $0x3c4] ss:$16 sps:$4 sm:$0xff]   ;;  %v4073_v32 = vld [vmem:[#allocation7 + $0x3cc] ss:$16 sps:$4 sm:$0xff]  }
 0x109   :  { %1706 = vmatprep.subr.bf16.mxu0 %v3977_v33  ;;  %1792 = vmatprep.subr.bf16.mxu1 %v3980_v34  ;;  %v4068_v33 = vld [vmem:[#allocation7 + $0x3c0] ss:$16 sps:$4 sm:$0xff]   ;;  %v4071_v34 = vld [vmem:[#allocation7 + $0x3c8] ss:$16 sps:$4 sm:$0xff]  }
 0x10c   :  { %1707 = vmatpush1.bf16.msra.mxu0 %v3975_v35  ;;  %1793 = vmatpush1.bf16.msra.mxu1 %v3978_v36  ;;  %v4076_v35 = vld [vmem:[#allocation7 + $0x3e4] ss:$16 sps:$4 sm:$0xff]   ;;  %v4079_v36 = vld [vmem:[#allocation7 + $0x3ec] ss:$16 sps:$4 sm:$0xff]  }
 0x10d   :  { %1719 = vmatprep.subr.bf16.mxu0 %v3986_v37  ;;  %1805 = vmatprep.subr.bf16.mxu1 %v3989_v38  ;;  %v4074_v37 = vld [vmem:[#allocation7 + $0x3e0] ss:$16 sps:$4 sm:$0xff]   ;;  %v4077_v38 = vld [vmem:[#allocation7 + $0x3e8] ss:$16 sps:$4 sm:$0xff]  }
 0x10f   :  { %1709 = vmatmul.mubr.bf16.vlgmr.msra.gmra.mrb[0].mxu0 %v3981_v39  ;;  %1795 = vmatmul.mubr.bf16.vlgmr.msra.gmra.mrb[0].mxu1 %v3981_v39  ;;  %v4085_v39 = vld [vmem:[#allocation10 + $0x4] ss:$16 sps:$4 sm:$0xff]  }
 0x110   :  { %1720 = vmatpush1.bf16.msra.mxu0 %v3984_v40  ;;  %1806 = vmatpush1.bf16.msra.mxu1 %v3987_v41  ;;  %v4088_v40 = vld [vmem:[#allocation10 + $0xc] ss:$16 sps:$4 sm:$0xff]   ;;  %v4080_v41 = vld [vmem:[#allocation2 + $0x8] ss:$16 sps:$4 sm:$0xff]  }
 0x111   :  { %1721 = vmatprep.subr.bf16.mxu0 %v3992_v42  ;;  %1807 = vmatprep.subr.bf16.mxu1 %v3995_v43  ;;  %v4083_v42 = vld [vmem:[#allocation10] ss:$16 sps:$4 sm:$0xff]   ;;  %v4086_v43 = vld [vmem:[#allocation10 + $0x8] ss:$16 sps:$4 sm:$0xff]  }
 0x112   :  { %1751 = vmatprep.mubr.bf16.mxu0 %v4082_v44  ;;  %1837 = vmatprep.mubr.bf16.mxu1 %v4082_v44  ;;  %v4091_v44 = vld [vmem:[#allocation10 + $0x24] ss:$16 sps:$4 sm:$0xff]  }
 0x114   :  { %1722 = vmatpush1.bf16.msra.mxu0 %v3990_v45  ;;  %1808 = vmatpush1.bf16.msra.mxu1 %v3993_v46  ;;  %v4094_v45 = vld [vmem:[#allocation10 + $0x2c] ss:$16 sps:$4 sm:$0xff]   ;;  %v4089_v46 = vld [vmem:[#allocation10 + $0x20] ss:$16 sps:$4 sm:$0xff]  }
 0x115   :  { %1723 = vmatprep.subr.bf16.mxu0 %v3998_v47  ;;  %1809 = vmatprep.subr.bf16.mxu1 %v4001_v48  ;;  %v4092_v47 = vld [vmem:[#allocation10 + $0x28] ss:$16 sps:$4 sm:$0xff]   ;;  %v4097_v48 = vld [vmem:[#allocation10 + $0x44] ss:$16 sps:$4 sm:$0xff]  }
 0x118   :  { %1724 = vmatpush1.bf16.msra.mxu0 %v3996_v49  ;;  %1810 = vmatpush1.bf16.msra.mxu1 %v3999_v50  ;;  %v4100_v49 = vld [vmem:[#allocation10 + $0x4c] ss:$16 sps:$4 sm:$0xff]   ;;  %v4095_v50 = vld [vmem:[#allocation10 + $0x40] ss:$16 sps:$4 sm:$0xff]  }
 0x119   :  { %1725 = vmatprep.subr.bf16.mxu0 %v4004_v51  ;;  %1811 = vmatprep.subr.bf16.mxu1 %v4007_v52  ;;  %v4098_v51 = vld [vmem:[#allocation10 + $0x48] ss:$16 sps:$4 sm:$0xff]   ;;  %v4103_v52 = vld [vmem:[#allocation10 + $0x64] ss:$16 sps:$4 sm:$0xff]  }
 0x11c   :  { %1726 = vmatpush1.bf16.msra.mxu0 %v4002_v53  ;;  %1812 = vmatpush1.bf16.msra.mxu1 %v4005_v54  ;;  %v4106_v53 = vld [vmem:[#allocation10 + $0x6c] ss:$16 sps:$4 sm:$0xff]   ;;  %v4101_v54 = vld [vmem:[#allocation10 + $0x60] ss:$16 sps:$4 sm:$0xff]  }
 0x11d   :  { %1727 = vmatprep.subr.bf16.mxu0 %v4010_v55  ;;  %1813 = vmatprep.subr.bf16.mxu1 %v4013_v56  ;;  %v4104_v55 = vld [vmem:[#allocation10 + $0x68] ss:$16 sps:$4 sm:$0xff]   ;;  %v4109_v56 = vld [vmem:[#allocation10 + $0x84] ss:$16 sps:$4 sm:$0xff]  }
 0x120   :  { %1728 = vmatpush1.bf16.msra.mxu0 %v4008_v57  ;;  %1814 = vmatpush1.bf16.msra.mxu1 %v4011_v58  ;;  %v4112_v57 = vld [vmem:[#allocation10 + $0x8c] ss:$16 sps:$4 sm:$0xff]   ;;  %v4107_v58 = vld [vmem:[#allocation10 + $0x80] ss:$16 sps:$4 sm:$0xff]  }
 0x121   :  { %1729 = vmatprep.subr.bf16.mxu0 %v4016_v59  ;;  %1815 = vmatprep.subr.bf16.mxu1 %v4019_v60  ;;  %v4110_v59 = vld [vmem:[#allocation10 + $0x88] ss:$16 sps:$4 sm:$0xff]   ;;  %v4115_v60 = vld [vmem:[#allocation10 + $0xa4] ss:$16 sps:$4 sm:$0xff]  }
 0x124   :  { %1730 = vmatpush1.bf16.msra.mxu0 %v4014_v61  ;;  %1816 = vmatpush1.bf16.msra.mxu1 %v4017_v62  ;;  %v4118_v61 = vld [vmem:[#allocation10 + $0xac] ss:$16 sps:$4 sm:$0xff]   ;;  %v4113_v62 = vld [vmem:[#allocation10 + $0xa0] ss:$16 sps:$4 sm:$0xff]  }
 0x125   :  { %1731 = vmatprep.subr.bf16.mxu0 %v4022_v63  ;;  %1817 = vmatprep.subr.bf16.mxu1 %v4025_v0  ;;  %v4116_v63 = vld [vmem:[#allocation10 + $0xa8] ss:$16 sps:$4 sm:$0xff]   ;;  %v4121_v0 = vld [vmem:[#allocation10 + $0xc4] ss:$16 sps:$4 sm:$0xff]  }
 0x128   :  { %1732 = vmatpush1.bf16.msra.mxu0 %v4020_v1  ;;  %1818 = vmatpush1.bf16.msra.mxu1 %v4023_v2  ;;  %v4124_v1 = vld [vmem:[#allocation10 + $0xcc] ss:$16 sps:$4 sm:$0xff]   ;;  %v4119_v2 = vld [vmem:[#allocation10 + $0xc0] ss:$16 sps:$4 sm:$0xff]  }
 0x129   :  { %1733 = vmatprep.subr.bf16.mxu0 %v4028_v3  ;;  %1819 = vmatprep.subr.bf16.mxu1 %v4031_v4  ;;  %v4122_v3 = vld [vmem:[#allocation10 + $0xc8] ss:$16 sps:$4 sm:$0xff]   ;;  %v4127_v4 = vld [vmem:[#allocation10 + $0xe4] ss:$16 sps:$4 sm:$0xff]  }
 0x12c   :  { %1734 = vmatpush1.bf16.msra.mxu0 %v4026_v5  ;;  %1820 = vmatpush1.bf16.msra.mxu1 %v4029_v6  ;;  %v4130_v5 = vld [vmem:[#allocation10 + $0xec] ss:$16 sps:$4 sm:$0xff]   ;;  %v4125_v6 = vld [vmem:[#allocation10 + $0xe0] ss:$16 sps:$4 sm:$0xff]  }
 0x12d   :  { %1735 = vmatprep.subr.bf16.mxu0 %v4034_v7  ;;  %1821 = vmatprep.subr.bf16.mxu1 %v4037_v8  ;;  %v4128_v7 = vld [vmem:[#allocation10 + $0xe8] ss:$16 sps:$4 sm:$0xff]   ;;  %v4133_v8 = vld [vmem:[#allocation10 + $0x104] ss:$16 sps:$4 sm:$0xff]  }
 0x130   :  { %1736 = vmatpush1.bf16.msra.mxu0 %v4032_v9  ;;  %1822 = vmatpush1.bf16.msra.mxu1 %v4035_v10  ;;  %v4136_v9 = vld [vmem:[#allocation10 + $0x10c] ss:$16 sps:$4 sm:$0xff]   ;;  %v4131_v10 = vld [vmem:[#allocation10 + $0x100] ss:$16 sps:$4 sm:$0xff]  }
 0x131   :  { %1737 = vmatprep.subr.bf16.mxu0 %v4040_v11  ;;  %1823 = vmatprep.subr.bf16.mxu1 %v4043_v12  ;;  %v4134_v11 = vld [vmem:[#allocation10 + $0x108] ss:$16 sps:$4 sm:$0xff]   ;;  %v4139_v12 = vld [vmem:[#allocation10 + $0x124] ss:$16 sps:$4 sm:$0xff]  }
 0x134   :  { %1738 = vmatpush1.bf16.msra.mxu0 %v4038_v13  ;;  %1824 = vmatpush1.bf16.msra.mxu1 %v4041_v14  ;;  %v4142_v13 = vld [vmem:[#allocation10 + $0x12c] ss:$16 sps:$4 sm:$0xff]   ;;  %v4137_v14 = vld [vmem:[#allocation10 + $0x120] ss:$16 sps:$4 sm:$0xff]  }
 0x135   :  { %1739 = vmatprep.subr.bf16.mxu0 %v4046_v15  ;;  %1825 = vmatprep.subr.bf16.mxu1 %v4049_v16  ;;  %v4140_v15 = vld [vmem:[#allocation10 + $0x128] ss:$16 sps:$4 sm:$0xff]   ;;  %v4145_v16 = vld [vmem:[#allocation10 + $0x144] ss:$16 sps:$4 sm:$0xff]  }
 0x138   :  { %1740 = vmatpush1.bf16.msra.mxu0 %v4044_v17  ;;  %1826 = vmatpush1.bf16.msra.mxu1 %v4047_v18  ;;  %v4148_v17 = vld [vmem:[#allocation10 + $0x14c] ss:$16 sps:$4 sm:$0xff]   ;;  %v4143_v18 = vld [vmem:[#allocation10 + $0x140] ss:$16 sps:$4 sm:$0xff]  }
 0x139   :  { %1741 = vmatprep.subr.bf16.mxu0 %v4052_v19  ;;  %1827 = vmatprep.subr.bf16.mxu1 %v4055_v20  ;;  %v4146_v19 = vld [vmem:[#allocation10 + $0x148] ss:$16 sps:$4 sm:$0xff]   ;;  %v4151_v20 = vld [vmem:[#allocation10 + $0x164] ss:$16 sps:$4 sm:$0xff]  }
 0x13c   :  { %1742 = vmatpush1.bf16.msra.mxu0 %v4050_v21  ;;  %1828 = vmatpush1.bf16.msra.mxu1 %v4053_v22  ;;  %v4154_v21 = vld [vmem:[#allocation10 + $0x16c] ss:$16 sps:$4 sm:$0xff]   ;;  %v4149_v22 = vld [vmem:[#allocation10 + $0x160] ss:$16 sps:$4 sm:$0xff]  }
 0x13d   :  { %1743 = vmatprep.subr.bf16.mxu0 %v4058_v23  ;;  %1829 = vmatprep.subr.bf16.mxu1 %v4061_v24  ;;  %v4152_v23 = vld [vmem:[#allocation10 + $0x168] ss:$16 sps:$4 sm:$0xff]   ;;  %v4157_v24 = vld [vmem:[#allocation10 + $0x184] ss:$16 sps:$4 sm:$0xff]  }
 0x140   :  { %1744 = vmatpush1.bf16.msra.mxu0 %v4056_v25  ;;  %1830 = vmatpush1.bf16.msra.mxu1 %v4059_v26  ;;  %v4160_v25 = vld [vmem:[#allocation10 + $0x18c] ss:$16 sps:$4 sm:$0xff]   ;;  %v4155_v26 = vld [vmem:[#allocation10 + $0x180] ss:$16 sps:$4 sm:$0xff]  }
 0x141   :  { %1745 = vmatprep.subr.bf16.mxu0 %v4064_v27  ;;  %1831 = vmatprep.subr.bf16.mxu1 %v4067_v28  ;;  %v4158_v27 = vld [vmem:[#allocation10 + $0x188] ss:$16 sps:$4 sm:$0xff]   ;;  %v4163_v28 = vld [vmem:[#allocation10 + $0x1a4] ss:$16 sps:$4 sm:$0xff]  }
 0x144   :  { %1746 = vmatpush1.bf16.msra.mxu0 %v4062_v29  ;;  %1832 = vmatpush1.bf16.msra.mxu1 %v4065_v30  ;;  %v4166_v29 = vld [vmem:[#allocation10 + $0x1ac] ss:$16 sps:$4 sm:$0xff]   ;;  %v4161_v30 = vld [vmem:[#allocation10 + $0x1a0] ss:$16 sps:$4 sm:$0xff]  }
 0x145   :  { %1747 = vmatprep.subr.bf16.mxu0 %v4070_v31  ;;  %1833 = vmatprep.subr.bf16.mxu1 %v4073_v32  ;;  %v4164_v31 = vld [vmem:[#allocation10 + $0x1a8] ss:$16 sps:$4 sm:$0xff]   ;;  %v4169_v32 = vld [vmem:[#allocation10 + $0x1c4] ss:$16 sps:$4 sm:$0xff]  }
 0x148   :  { %1748 = vmatpush1.bf16.msra.mxu0 %v4068_v33  ;;  %1834 = vmatpush1.bf16.msra.mxu1 %v4071_v34  ;;  %v4172_v33 = vld [vmem:[#allocation10 + $0x1cc] ss:$16 sps:$4 sm:$0xff]   ;;  %v4167_v34 = vld [vmem:[#allocation10 + $0x1c0] ss:$16 sps:$4 sm:$0xff]  }
 0x149   :  { %1749 = vmatprep.subr.bf16.mxu0 %v4076_v35  ;;  %1835 = vmatprep.subr.bf16.mxu1 %v4079_v36  ;;  %v4170_v35 = vld [vmem:[#allocation10 + $0x1c8] ss:$16 sps:$4 sm:$0xff]   ;;  %v4175_v36 = vld [vmem:[#allocation10 + $0x1e4] ss:$16 sps:$4 sm:$0xff]  }
 0x14c   :  { %1750 = vmatpush1.bf16.msra.mxu0 %v4074_v37  ;;  %1836 = vmatpush1.bf16.msra.mxu1 %v4077_v38  ;;  %v4178_v37 = vld [vmem:[#allocation10 + $0x1ec] ss:$16 sps:$4 sm:$0xff]   ;;  %v4173_v38 = vld [vmem:[#allocation10 + $0x1e0] ss:$16 sps:$4 sm:$0xff]  }
 0x14d   :  { %2680 = vmatprep.subr.bf16.mxu0 %v4085_v39  ;;  %2766 = vmatprep.subr.bf16.mxu1 %v4088_v40  ;;  %v4176_v39 = vld [vmem:[#allocation10 + $0x1e8] ss:$16 sps:$4 sm:$0xff]   ;;  %v4181_v40 = vld [vmem:[#allocation10 + $0x204] ss:$16 sps:$4 sm:$0xff]  }
 0x14f   :  { %1752 = vmatmul.mubr.bf16.vlgmr.msra.gmra.mrb[0].mxu0 %v4080_v41  ;;  %1838 = vmatmul.mubr.bf16.vlgmr.msra.gmra.mrb[0].mxu1 %v4080_v41  ;;  %v4184_v41 = vld [vmem:[#allocation10 + $0x20c] ss:$16 sps:$4 sm:$0xff]  }
 0x150   :  { %2681 = vmatpush1.bf16.msra.mxu0 %v4083_v42  ;;  %2767 = vmatpush1.bf16.msra.mxu1 %v4086_v43  ;;  %v1850_v42 = vlaneseq }
 0x151   :  { %2682 = vmatprep.subr.bf16.mxu0 %v4091_v44  ;;  %2768 = vmatprep.subr.bf16.mxu1 %v4094_v45 }
 0x152   :  { %v4629_v43 = vshrl.u32 %v1850_v42, 7  ;;  %v4218_v42 = vld [vmem:[#allocation10 + $0x2c8] ss:$16 sps:$4 sm:$0xff]  }
 0x154   :  { %2683 = vmatpush1.bf16.msra.mxu0 %v4089_v46  ;;  %2769 = vmatpush1.bf16.msra.mxu1 %v4092_v47  ;;  %v1852_v44 = vsub.s32 0, %v4629_v43  ;;  %v1860_v45 = vsub.s32 2, %v4629_v43  ;;  %v1848_v46 = vld [vmem:[%s4680_s4] sm:$0xf]  ;;  %v1856_v47 = vsub.s32 1, %v4629_v43 }
 0x155   :  { %2684 = vmatprep.subr.bf16.mxu0 %v4097_v48  ;;  %2770 = vmatprep.subr.bf16.mxu1 %v4100_v49  ;;  %v1864_v48 = vsub.s32 3, %v4629_v43 }
 0x156   :  { %v1853_v49 = vrot.slane %v1848_v46, %v1852_v44 }
 0x158   :  { %2685 = vmatpush1.bf16.msra.mxu0 %v4095_v50  ;;  %2771 = vmatpush1.bf16.msra.mxu1 %v4098_v51  ;;  %v1861_v50 = vrot.slane %v1848_v46, %v1860_v45  ;;  %v1857_v51 = vrot.slane %v1848_v46, %v1856_v47 }
 0x159   :  { %2686 = vmatprep.subr.bf16.mxu0 %v4103_v52  ;;  %2772 = vmatprep.subr.bf16.mxu1 %v4106_v53  ;;  %v1865_v52 = vrot.slane %v1848_v46, %v1864_v48  ;;  %v4223_v46 = vld [vmem:[#allocation10 + $0x2e4] ss:$16 sps:$4 sm:$0xff]  }
 0x15c   :  { %2687 = vmatpush1.bf16.msra.mxu0 %v4101_v54  ;;  %2773 = vmatpush1.bf16.msra.mxu1 %v4104_v55 }
 0x15d   :  { %2688 = vmatprep.subr.bf16.mxu0 %v4109_v56  ;;  %2774 = vmatprep.subr.bf16.mxu1 %v4112_v57 }
 0x160   :  { %2689 = vmatpush1.bf16.msra.mxu0 %v4107_v58  ;;  %2775 = vmatpush1.bf16.msra.mxu1 %v4110_v59 }
 0x161   :  { %2690 = vmatprep.subr.bf16.mxu0 %v4115_v60  ;;  %2776 = vmatprep.subr.bf16.mxu1 %v4118_v61 }
 0x164   :  { %2691 = vmatpush1.bf16.msra.mxu0 %v4113_v62  ;;  %2777 = vmatpush1.bf16.msra.mxu1 %v4116_v63 }
 0x165   :  { %2692 = vmatprep.subr.bf16.mxu0 %v4121_v0  ;;  %2778 = vmatprep.subr.bf16.mxu1 %v4124_v1 }
 0x168   :  { %2693 = vmatpush1.bf16.msra.mxu0 %v4119_v2  ;;  %2779 = vmatpush1.bf16.msra.mxu1 %v4122_v3 }
 0x169   :  { %2694 = vmatprep.subr.bf16.mxu0 %v4127_v4  ;;  %2780 = vmatprep.subr.bf16.mxu1 %v4130_v5 }
 0x16c   :  { %2695 = vmatpush1.bf16.msra.mxu0 %v4125_v6  ;;  %2781 = vmatpush1.bf16.msra.mxu1 %v4128_v7 }
 0x16d   :  { %2696 = vmatprep.subr.bf16.mxu0 %v4133_v8  ;;  %2782 = vmatprep.subr.bf16.mxu1 %v4136_v9 }
 0x170   :  { %2697 = vmatpush1.bf16.msra.mxu0 %v4131_v10  ;;  %2783 = vmatpush1.bf16.msra.mxu1 %v4134_v11 }
 0x171   :  { %2698 = vmatprep.subr.bf16.mxu0 %v4139_v12  ;;  %2784 = vmatprep.subr.bf16.mxu1 %v4142_v13 }
 0x174   :  { %2699 = vmatpush1.bf16.msra.mxu0 %v4137_v14  ;;  %2785 = vmatpush1.bf16.msra.mxu1 %v4140_v15 }
 0x175   :  { %2700 = vmatprep.subr.bf16.mxu0 %v4145_v16  ;;  %2786 = vmatprep.subr.bf16.mxu1 %v4148_v17  ;;  %v4179_v17 = vld [vmem:[#allocation10 + $0x200] ss:$16 sps:$4 sm:$0xff]  }
 0x178   :  { %2701 = vmatpush1.bf16.msra.mxu0 %v4143_v18  ;;  %2787 = vmatpush1.bf16.msra.mxu1 %v4146_v19  ;;  %v4182_v18 = vld [vmem:[#allocation10 + $0x208] ss:$16 sps:$4 sm:$0xff]   ;;  %v4187_v19 = vld [vmem:[#allocation10 + $0x224] ss:$16 sps:$4 sm:$0xff]  }
 0x179   :  { %2702 = vmatprep.subr.bf16.mxu0 %v4151_v20  ;;  %2788 = vmatprep.subr.bf16.mxu1 %v4154_v21  ;;  %v4190_v20 = vld [vmem:[#allocation10 + $0x22c] ss:$16 sps:$4 sm:$0xff]   ;;  %v4185_v21 = vld [vmem:[#allocation10 + $0x220] ss:$16 sps:$4 sm:$0xff]  }
 0x17c   :  { %2703 = vmatpush1.bf16.msra.mxu0 %v4149_v22  ;;  %2789 = vmatpush1.bf16.msra.mxu1 %v4152_v23  ;;  %v4188_v22 = vld [vmem:[#allocation10 + $0x228] ss:$16 sps:$4 sm:$0xff]   ;;  %v4193_v23 = vld [vmem:[#allocation10 + $0x244] ss:$16 sps:$4 sm:$0xff]  }
 0x17d   :  { %2704 = vmatprep.subr.bf16.mxu0 %v4157_v24  ;;  %2790 = vmatprep.subr.bf16.mxu1 %v4160_v25  ;;  %v4196_v24 = vld [vmem:[#allocation10 + $0x24c] ss:$16 sps:$4 sm:$0xff]   ;;  %v4191_v25 = vld [vmem:[#allocation10 + $0x240] ss:$16 sps:$4 sm:$0xff]  }
 0x180   :  { %2705 = vmatpush1.bf16.msra.mxu0 %v4155_v26  ;;  %2791 = vmatpush1.bf16.msra.mxu1 %v4158_v27  ;;  %v4194_v26 = vld [vmem:[#allocation10 + $0x248] ss:$16 sps:$4 sm:$0xff]   ;;  %v4199_v27 = vld [vmem:[#allocation10 + $0x264] ss:$16 sps:$4 sm:$0xff]  }
 0x181   :  { %2706 = vmatprep.subr.bf16.mxu0 %v4163_v28  ;;  %2792 = vmatprep.subr.bf16.mxu1 %v4166_v29  ;;  %v4202_v28 = vld [vmem:[#allocation10 + $0x26c] ss:$16 sps:$4 sm:$0xff]   ;;  %v4197_v29 = vld [vmem:[#allocation10 + $0x260] ss:$16 sps:$4 sm:$0xff]  }
 0x184   :  { %2707 = vmatpush1.bf16.msra.mxu0 %v4161_v30  ;;  %2793 = vmatpush1.bf16.msra.mxu1 %v4164_v31  ;;  %v4200_v30 = vld [vmem:[#allocation10 + $0x268] ss:$16 sps:$4 sm:$0xff]   ;;  %v4205_v31 = vld [vmem:[#allocation10 + $0x284] ss:$16 sps:$4 sm:$0xff]  }
 0x185   :  { %2708 = vmatprep.subr.bf16.mxu0 %v4169_v32  ;;  %2794 = vmatprep.subr.bf16.mxu1 %v4172_v33  ;;  %v4208_v32 = vld [vmem:[#allocation10 + $0x28c] ss:$16 sps:$4 sm:$0xff]   ;;  %v4203_v33 = vld [vmem:[#allocation10 + $0x280] ss:$16 sps:$4 sm:$0xff]  }
 0x188   :  { %2709 = vmatpush1.bf16.msra.mxu0 %v4167_v34  ;;  %2795 = vmatpush1.bf16.msra.mxu1 %v4170_v35  ;;  %v4206_v34 = vld [vmem:[#allocation10 + $0x288] ss:$16 sps:$4 sm:$0xff]   ;;  %v4211_v35 = vld [vmem:[#allocation10 + $0x2a4] ss:$16 sps:$4 sm:$0xff]  }
 0x189   :  { %2710 = vmatprep.subr.bf16.mxu0 %v4175_v36  ;;  %2796 = vmatprep.subr.bf16.mxu1 %v4178_v37  ;;  %v4214_v36 = vld [vmem:[#allocation10 + $0x2ac] ss:$16 sps:$4 sm:$0xff]   ;;  %v4209_v37 = vld [vmem:[#allocation10 + $0x2a0] ss:$16 sps:$4 sm:$0xff]  }
 0x18c   :  { %2711 = vmatpush1.bf16.msra.mxu0 %v4173_v38  ;;  %2797 = vmatpush1.bf16.msra.mxu1 %v4176_v39  ;;  %v4212_v38 = vld [vmem:[#allocation10 + $0x2a8] ss:$16 sps:$4 sm:$0xff]   ;;  %v4217_v39 = vld [vmem:[#allocation10 + $0x2c4] ss:$16 sps:$4 sm:$0xff]  }
 0x18d   :  { %2723 = vmatprep.subr.bf16.mxu0 %v4181_v40  ;;  %2809 = vmatprep.subr.bf16.mxu1 %v4184_v41  ;;  %v4220_v40 = vld [vmem:[#allocation10 + $0x2cc] ss:$16 sps:$4 sm:$0xff]   ;;  %v4215_v41 = vld [vmem:[#allocation10 + $0x2c0] ss:$16 sps:$4 sm:$0xff]  }
 0x222   :  { %v1753_v53 = vpop.f32.mrb[0].mxu0  ;;  %v1839_v54 = vpop.f32.mrb[0].mxu1 }
 0x223   :  { %v1870_v55 = vadd.f32 %v1853_v49, %v1753_v53  ;;  %v1872_v56 = vadd.f32 %v1861_v50, %v1839_v54  ;;  %v1755_v57 = vpop.f32.mrb[1].mxu0  ;;  %v1841_v58 = vpop.f32.mrb[1].mxu1  ;;  %v4232_v53 = vld [vmem:[#allocation10 + $0x30c] ss:$16 sps:$4 sm:$0xff]   ;;  %v4227_v54 = vld [vmem:[#allocation10 + $0x300] ss:$16 sps:$4 sm:$0xff]  }
 0x224   :  { %v1871_v59 = vadd.f32 %v1857_v51, %v1755_v57  ;;  %v1873_v60 = vadd.f32 %v1865_v52, %v1841_v58  ;;  %v1757_v61 = vpop.f32.mrb[2].mxu0  ;;  %v1843_v62 = vpop.f32.mrb[2].mxu1  ;;  %v4238_v57 = vld [vmem:[#allocation10 + $0x32c] ss:$16 sps:$4 sm:$0xff]   ;;  %v4233_v58 = vld [vmem:[#allocation10 + $0x320] ss:$16 sps:$4 sm:$0xff]  }
 0x225   :  { %v1874_v63 = vadd.f32 %v1853_v49, %v1757_v61  ;;  %v1876_v0 = vadd.f32 %v1861_v50, %v1843_v62  ;;  %v1759_v1 = vpop.f32.mrb[3].mxu0  ;;  %v1845_v2 = vpop.f32.mrb[3].mxu1  ;;  %v1878_v5 = vmax.f32 %v1870_v55, 0.0  ;;  %v1880_v6 = vmax.f32 %v1872_v56, 0.0  ;;  %v4226_v49 = vld [vmem:[#allocation10 + $0x2ec] ss:$16 sps:$4 sm:$0xff]  }
 0x226   :  { %v1875_v3 = vadd.f32 %v1857_v51, %v1759_v1  ;;  %v1877_v4 = vadd.f32 %v1865_v52, %v1845_v2  ;;  %v1879_v9 = vmax.f32 %v1871_v59, 0.0  ;;  %v1881_v10 = vmax.f32 %v1873_v60, 0.0  ;;  %v4221_v50 = vld [vmem:[#allocation10 + $0x2e0] ss:$16 sps:$4 sm:$0xff]   ;;  %v4224_v51 = vld [vmem:[#allocation10 + $0x2e8] ss:$16 sps:$4 sm:$0xff]  }
 0x227   :  { %v1882_v7 = vmax.f32 %v1874_v63, 0.0  ;;  %v1884_v8 = vmax.f32 %v1876_v0, 0.0  ;;  %v4229_v52 = vld [vmem:[#allocation10 + $0x304] ss:$16 sps:$4 sm:$0xff]   ;;  %v4230_v55 = vld [vmem:[#allocation10 + $0x308] ss:$16 sps:$4 sm:$0xff]  }
 0x228   :  { %v1883_v11 = vmax.f32 %v1875_v3, 0.0  ;;  %v1885_v12 = vmax.f32 %v1877_v4, 0.0  ;;  %v4235_v56 = vld [vmem:[#allocation10 + $0x324] ss:$16 sps:$4 sm:$0xff]   ;;  %v4236_v59 = vld [vmem:[#allocation10 + $0x328] ss:$16 sps:$4 sm:$0xff]  }
 0x229   :  { %v1886_v13 = vpack.c.bf16 %v1882_v7, %v1878_v5  ;;  %v4646_v14 = vpack.c.bf16 %v1884_v8, %v1880_v6  ;;  %v4241_v60 = vld [vmem:[#allocation10 + $0x344] ss:$16 sps:$4 sm:$0xff]   ;;  %v4244_v61 = vld [vmem:[#allocation10 + $0x34c] ss:$16 sps:$4 sm:$0xff]   ;;  %v4239_v62 = vld [vmem:[#allocation10 + $0x340] ss:$16 sps:$4 sm:$0xff]  }
 0x22a   :  { %v1887_v15 = vpack.c.bf16 %v1883_v11, %v1879_v9  ;;  %v1889_v16 = vpack.c.bf16 %v1885_v12, %v1881_v10  ;;  %v4242_v63 = vld [vmem:[#allocation10 + $0x348] ss:$16 sps:$4 sm:$0xff]   ;;  %v4247_v0 = vld [vmem:[#allocation10 + $0x364] ss:$16 sps:$4 sm:$0xff]   ;;  %v4250_v1 = vld [vmem:[#allocation10 + $0x36c] ss:$16 sps:$4 sm:$0xff]  }
 0x22b   :  { %v4245_v2 = vld [vmem:[#allocation10 + $0x360] ss:$16 sps:$4 sm:$0xff]   ;;  %v4248_v3 = vld [vmem:[#allocation10 + $0x368] ss:$16 sps:$4 sm:$0xff]   ;;  %v4253_v4 = vld [vmem:[#allocation10 + $0x384] ss:$16 sps:$4 sm:$0xff]  }
 0x22c   :  { %2712 = vmatprep.mubr.bf16.mxu0 %v1887_v15  ;;  %2798 = vmatprep.mubr.bf16.mxu1 %v1887_v15  ;;  %v4256_v5 = vld [vmem:[#allocation10 + $0x38c] ss:$16 sps:$4 sm:$0xff]   ;;  %v4251_v6 = vld [vmem:[#allocation10 + $0x380] ss:$16 sps:$4 sm:$0xff]   ;;  %v4254_v7 = vld [vmem:[#allocation10 + $0x388] ss:$16 sps:$4 sm:$0xff]  }
 0x22d   :  { %2713 = vmatmul.mubr.bf16.vlgmr.msra.gmra.mrb[4].mxu0 %v1886_v13  ;;  %2799 = vmatmul.mubr.bf16.vlgmr.msra.gmra.mrb[4].mxu1 %v1886_v13  ;;  %v4259_v8 = vld [vmem:[#allocation10 + $0x3a4] ss:$16 sps:$4 sm:$0xff]   ;;  %v4262_v9 = vld [vmem:[#allocation10 + $0x3ac] ss:$16 sps:$4 sm:$0xff]   ;;  %v4257_v10 = vld [vmem:[#allocation10 + $0x3a0] ss:$16 sps:$4 sm:$0xff]  }
 0x22e   :  { %2724 = vmatpush1.bf16.msra.mxu0 %v4179_v17  ;;  %2810 = vmatpush1.bf16.msra.mxu1 %v4182_v18  ;;  %v4260_v11 = vld [vmem:[#allocation10 + $0x3a8] ss:$16 sps:$4 sm:$0xff]   ;;  %v4265_v12 = vld [vmem:[#allocation10 + $0x3c4] ss:$16 sps:$4 sm:$0xff]   ;;  %v4268_v13 = vld [vmem:[#allocation10 + $0x3cc] ss:$16 sps:$4 sm:$0xff]  }
 0x22f   :  { %2755 = vmatprep.mubr.bf16.mxu0 %v1889_v16  ;;  %2841 = vmatprep.mubr.bf16.mxu1 %v1889_v16  ;;  %v4263_v15 = vld [vmem:[#allocation10 + $0x3c0] ss:$16 sps:$4 sm:$0xff]   ;;  %v4266_v16 = vld [vmem:[#allocation10 + $0x3c8] ss:$16 sps:$4 sm:$0xff]   ;;  %v4271_v17 = vld [vmem:[#allocation10 + $0x3e4] ss:$16 sps:$4 sm:$0xff]  }
 0x230   :  { %2725 = vmatprep.subr.bf16.mxu0 %v4187_v19  ;;  %2811 = vmatprep.subr.bf16.mxu1 %v4190_v20  ;;  %v4274_v18 = vld [vmem:[#allocation10 + $0x3ec] ss:$16 sps:$4 sm:$0xff]   ;;  %v4269_v19 = vld [vmem:[#allocation10 + $0x3e0] ss:$16 sps:$4 sm:$0xff]   ;;  %v4272_v20 = vld [vmem:[#allocation10 + $0x3e8] ss:$16 sps:$4 sm:$0xff]  }
 0x232   :  { %2726 = vmatpush1.bf16.msra.mxu0 %v4185_v21  ;;  %2812 = vmatpush1.bf16.msra.mxu1 %v4188_v22  ;;  %v4275_v21 = vld [vmem:[#allocation11 + $0x40] sm:$0xff]  }
 0x233   :  { %2727 = vmatprep.subr.bf16.mxu0 %v4193_v23  ;;  %2813 = vmatprep.subr.bf16.mxu1 %v4196_v24  ;;  %v4276_v22 = vld [vmem:[#allocation11 + $0xc0] sm:$0xff]  }
 0x234   :  { %v4277_v23 = vld [vmem:[#allocation11] sm:$0xff]  }
 0x235   :  { %v4278_v24 = vld [vmem:[#allocation11 + $0x80] sm:$0xff]  }
 0x236   :  { %2728 = vmatpush1.bf16.msra.mxu0 %v4191_v25  ;;  %2814 = vmatpush1.bf16.msra.mxu1 %v4194_v26  ;;  %v4279_v25 = vld [vmem:[#allocation11 + $0x48] sm:$0xff]  }
 0x237   :  { %2729 = vmatprep.subr.bf16.mxu0 %v4199_v27  ;;  %2815 = vmatprep.subr.bf16.mxu1 %v4202_v28  ;;  %v4280_v26 = vld [vmem:[#allocation11 + $0xc8] sm:$0xff]  }
 0x238   :  { %v4281_v27 = vld [vmem:[#allocation11 + $0x8] sm:$0xff]  }
 0x239   :  { %v4282_v28 = vld [vmem:[#allocation11 + $0x88] sm:$0xff]  }
 0x23a   :  { %2730 = vmatpush1.bf16.msra.mxu0 %v4197_v29  ;;  %2816 = vmatpush1.bf16.msra.mxu1 %v4200_v30  ;;  %v4283_v29 = vld [vmem:[#allocation11 + $0x50] sm:$0xff]  }
 0x23b   :  { %2731 = vmatprep.subr.bf16.mxu0 %v4205_v31  ;;  %2817 = vmatprep.subr.bf16.mxu1 %v4208_v32  ;;  %v4284_v30 = vld [vmem:[#allocation11 + $0xd0] sm:$0xff]  }
 0x23c   :  { %v4285_v31 = vld [vmem:[#allocation11 + $0x10] sm:$0xff]  }
 0x23d   :  { %v4286_v32 = vld [vmem:[#allocation11 + $0x90] sm:$0xff]  }
 0x23e   :  { %2732 = vmatpush1.bf16.msra.mxu0 %v4203_v33  ;;  %2818 = vmatpush1.bf16.msra.mxu1 %v4206_v34  ;;  %v4287_v33 = vld [vmem:[#allocation11 + $0x58] sm:$0xff]  }
 0x23f   :  { %2733 = vmatprep.subr.bf16.mxu0 %v4211_v35  ;;  %2819 = vmatprep.subr.bf16.mxu1 %v4214_v36  ;;  %v4288_v34 = vld [vmem:[#allocation11 + $0xd8] sm:$0xff]   ;;  %v4291_v36 = vld [vmem:[#allocation11 + $0x60] sm:$0xff]  }
 0x240   :  { %v4289_v35 = vld [vmem:[#allocation11 + $0x18] sm:$0xff]  }
 0x242   :  { %2734 = vmatpush1.bf16.msra.mxu0 %v4209_v37  ;;  %2820 = vmatpush1.bf16.msra.mxu1 %v4212_v38  ;;  %v4292_v37 = vld [vmem:[#allocation11 + $0xe0] sm:$0xff]  }
 0x243   :  { %2735 = vmatprep.subr.bf16.mxu0 %v4217_v39  ;;  %2821 = vmatprep.subr.bf16.mxu1 %v4220_v40  ;;  %v4293_v38 = vld [vmem:[#allocation11 + $0x20] sm:$0xff]   ;;  %v4295_v40 = vld [vmem:[#allocation11 + $0x68] sm:$0xff]  }
 0x244   :  { %v4294_v39 = vld [vmem:[#allocation11 + $0xa0] sm:$0xff]  }
 0x246   :  { %2736 = vmatpush1.bf16.msra.mxu0 %v4215_v41  ;;  %2822 = vmatpush1.bf16.msra.mxu1 %v4218_v42  ;;  %v4296_v41 = vld [vmem:[#allocation11 + $0xe8] sm:$0xff]  }
 0x247   :  { %2737 = vmatprep.subr.bf16.mxu0 %v4223_v46  ;;  %2823 = vmatprep.subr.bf16.mxu1 %v4226_v49  ;;  %v4297_v42 = vld [vmem:[#allocation11 + $0x28] sm:$0xff]   ;;  %v4299_v49 = vld [vmem:[#allocation11 + $0x70] sm:$0xff]  }
 0x248   :  { %v4298_v46 = vld [vmem:[#allocation11 + $0xa8] sm:$0xff]  }
 0x24a   :  { %2738 = vmatpush1.bf16.msra.mxu0 %v4221_v50  ;;  %2824 = vmatpush1.bf16.msra.mxu1 %v4224_v51  ;;  %v4300_v50 = vld [vmem:[#allocation11 + $0xf0] sm:$0xff]  }
 0x24b   :  { %2739 = vmatprep.subr.bf16.mxu0 %v4229_v52  ;;  %2825 = vmatprep.subr.bf16.mxu1 %v4232_v53  ;;  %v4301_v51 = vld [vmem:[#allocation11 + $0x30] sm:$0xff]   ;;  %v4303_v53 = vld [vmem:[#allocation11 + $0x78] sm:$0xff]  }
 0x24c   :  { %v4302_v52 = vld [vmem:[#allocation11 + $0xb0] sm:$0xff]  }
 0x24e   :  { %2740 = vmatpush1.bf16.msra.mxu0 %v4227_v54  ;;  %2826 = vmatpush1.bf16.msra.mxu1 %v4230_v55  ;;  %v4304_v54 = vld [vmem:[#allocation11 + $0xf8] sm:$0xff]  }
 0x24f   :  { %2741 = vmatprep.subr.bf16.mxu0 %v4235_v56  ;;  %2827 = vmatprep.subr.bf16.mxu1 %v4238_v57  ;;  %v4305_v55 = vld [vmem:[#allocation11 + $0x38] sm:$0xff]   ;;  %v2018_v57 = vld [vmem:[%s4682_s6] sm:$0xf] }
 0x250   :  { %v4306_v56 = vld [vmem:[#allocation11 + $0xb8] sm:$0xff]  }
 0x252   :  { %2742 = vmatpush1.bf16.msra.mxu0 %v4233_v58  ;;  %2828 = vmatpush1.bf16.msra.mxu1 %v4236_v59  ;;  %v2023_v58 = vrot.slane %v2018_v57, %v1852_v44  ;;  %v2031_v59 = vrot.slane %v2018_v57, %v1860_v45 }
 0x253   :  { %2743 = vmatprep.subr.bf16.mxu0 %v4241_v60  ;;  %2829 = vmatprep.subr.bf16.mxu1 %v4244_v61  ;;  %v2027_v60 = vrot.slane %v2018_v57, %v1856_v47  ;;  %v2035_v61 = vrot.slane %v2018_v57, %v1864_v48 }
 0x256   :  { %2744 = vmatpush1.bf16.msra.mxu0 %v4239_v62  ;;  %2830 = vmatpush1.bf16.msra.mxu1 %v4242_v63 }
 0x257   :  { %2745 = vmatprep.subr.bf16.mxu0 %v4247_v0  ;;  %2831 = vmatprep.subr.bf16.mxu1 %v4250_v1 }
 0x25a   :  { %2746 = vmatpush1.bf16.msra.mxu0 %v4245_v2  ;;  %2832 = vmatpush1.bf16.msra.mxu1 %v4248_v3 }
 0x25b   :  { %2747 = vmatprep.subr.bf16.mxu0 %v4253_v4  ;;  %2833 = vmatprep.subr.bf16.mxu1 %v4256_v5 }
 0x25e   :  { %2748 = vmatpush1.bf16.msra.mxu0 %v4251_v6  ;;  %2834 = vmatpush1.bf16.msra.mxu1 %v4254_v7 }
 0x25f   :  { %2749 = vmatprep.subr.bf16.mxu0 %v4259_v8  ;;  %2835 = vmatprep.subr.bf16.mxu1 %v4262_v9 }
 0x262   :  { %2750 = vmatpush1.bf16.msra.mxu0 %v4257_v10  ;;  %2836 = vmatpush1.bf16.msra.mxu1 %v4260_v11 }
 0x263   :  { %2751 = vmatprep.subr.bf16.mxu0 %v4265_v12  ;;  %2837 = vmatprep.subr.bf16.mxu1 %v4268_v13 }
 0x266   :  { %2752 = vmatpush1.bf16.msra.mxu0 %v4263_v15  ;;  %2838 = vmatpush1.bf16.msra.mxu1 %v4266_v16 }
 0x267   :  { %2753 = vmatprep.subr.bf16.mxu0 %v4271_v17  ;;  %2839 = vmatprep.subr.bf16.mxu1 %v4274_v18 }
 0x26a   :  { %2754 = vmatpush1.bf16.msra.mxu0 %v4269_v19  ;;  %2840 = vmatpush1.bf16.msra.mxu1 %v4272_v20 }
 0x26b   :  { %3637 = vmatprep.subr.bf16.mxu0 %v4275_v21  ;;  %3659 = vmatprep.subr.bf16.mxu1 %v4276_v22 }
 0x26d   :  { %2756 = vmatmul.mubr.bf16.vlgmr.msra.gmra.mrb[4].mxu0 %v4646_v14  ;;  %2842 = vmatmul.mubr.bf16.vlgmr.msra.gmra.mrb[4].mxu1 %v4646_v14  ;;  %v4290_v14 = vld [vmem:[#allocation11 + $0x98] sm:$0xff]  }
 0x26e   :  { %3638 = vmatpush3.bf16.msra.mxu0 %v4277_v23  ;;  %3660 = vmatpush3.bf16.msra.mxu1 %v4278_v24  ;;  %v3602_v24 = vld [vmem:[%s4684_s8] ss:$0 sm:$0xff]  ;;  %s4492_s8 = smov [#allocation13]  }
 0x26f   :  { %3639 = vmatprep.subr.bf16.mxu0 %v4279_v25  ;;  %3661 = vmatprep.subr.bf16.mxu1 %v4280_v26  ;;  %s3228_s20 = sshll.u32 %s4492_s8, 4  ;;  %s3229_s20 = int_to_ptr.vmem [resolvable:$true] %s3228_s20 }
 0x270   :  { %s4447_s21 = scalar_lea.vmem %s3229_s20, 256  ;;  %p4452_p7 = scmp.lt.s32.totalorder %s3229_s20, %s3229_s20 }
 0x271   :  { %p4448_p6 = scmp.ne.s32.totalorder %s3229_s20, %s4447_s21  ;;  %p4453_p8 = scmp.lt.s32.totalorder %s4447_s21, %s4447_s21 }
 0x272   :  { %3640 = vmatpush3.bf16.msra.mxu0 %v4281_v27  ;;  %3662 = vmatpush3.bf16.msra.mxu1 %v4282_v28 }
 0x273   :  { %3641 = vmatprep.subr.bf16.mxu0 %v4283_v29  ;;  %3663 = vmatprep.subr.bf16.mxu1 %v4284_v30  ;;  %p4454_p9 = por %p4453_p8, %p4452_p7 }
 0x275   :  { %p4455_p10 = pnand %p4454_p9, %p4448_p6 }
 0x276   :  { %3642 = vmatpush3.bf16.msra.mxu0 %v4285_v31  ;;  %3664 = vmatpush3.bf16.msra.mxu1 %v4286_v32 }
 0x277   :  { %3643 = vmatprep.subr.bf16.mxu0 %v4287_v33  ;;  %3665 = vmatprep.subr.bf16.mxu1 %v4288_v34 }
 0x27a   :  { %3644 = vmatpush3.bf16.msra.mxu0 %v4289_v35  ;;  %3666 = vmatpush3.bf16.msra.mxu1 %v4290_v14 }
 0x27b   :  { %3645 = vmatprep.subr.bf16.mxu0 %v4291_v36  ;;  %3667 = vmatprep.subr.bf16.mxu1 %v4292_v37 }
 0x27e   :  { %3646 = vmatpush3.bf16.msra.mxu0 %v4293_v38  ;;  %3668 = vmatpush3.bf16.msra.mxu1 %v4294_v39 }
 0x27f   :  { %3647 = vmatprep.subr.bf16.mxu0 %v4295_v40  ;;  %3669 = vmatprep.subr.bf16.mxu1 %v4296_v41 }
 0x282   :  { %3648 = vmatpush3.bf16.msra.mxu0 %v4297_v42  ;;  %3670 = vmatpush3.bf16.msra.mxu1 %v4298_v46 }
 0x283   :  { %3649 = vmatprep.subr.bf16.mxu0 %v4299_v49  ;;  %3671 = vmatprep.subr.bf16.mxu1 %v4300_v50 }
 0x286   :  { %3650 = vmatpush3.bf16.msra.mxu0 %v4301_v51  ;;  %3672 = vmatpush3.bf16.msra.mxu1 %v4302_v52 }
 0x287   :  { %3651 = vmatprep.subr.bf16.mxu0 %v4303_v53  ;;  %3673 = vmatprep.subr.bf16.mxu1 %v4304_v54 }
 0x28a   :  { %3652 = vmatpush3.bf16.msra.mxu0 %v4305_v55  ;;  %3674 = vmatpush3.bf16.msra.mxu1 %v4306_v56 }
 0x340   :  { %v2757_v62 = vpop.f32.mrb[4].mxu0  ;;  %v2843_v63 = vpop.f32.mrb[4].mxu1 }
 0x341   :  { %v3681_v0 = vadd.f32 %v2757_v62, %v2023_v58  ;;  %v3685_v1 = vadd.f32 %v2843_v63, %v2031_v59  ;;  %v2759_v2 = vpop.f32.mrb[5].mxu0  ;;  %v2845_v3 = vpop.f32.mrb[5].mxu1 }
 0x342   :  { %v3682_v4 = vadd.f32 %v2759_v2, %v2027_v60  ;;  %v3686_v5 = vadd.f32 %v2845_v3, %v2035_v61  ;;  %v2761_v6 = vpop.f32.mrb[6].mxu0  ;;  %v2847_v7 = vpop.f32.mrb[6].mxu1 }
 0x343   :  { %v3683_v44 = vadd.f32 %v2761_v6, %v2023_v58  ;;  %v3687_v8 = vadd.f32 %v2847_v7, %v2031_v59  ;;  %v2763_v9 = vpop.f32.mrb[7].mxu0  ;;  %v2849_v45 = vpop.f32.mrb[7].mxu1  ;;  %v2852_v47 = vmax.f32 %v3681_v0, 0.0  ;;  %v2854_v12 = vmax.f32 %v3685_v1, 0.0 }
 0x344   :  { %v3684_v10 = vadd.f32 %v2763_v9, %v2027_v60  ;;  %v3688_v11 = vadd.f32 %v2849_v45, %v2035_v61  ;;  %v2853_v13 = vmax.f32 %v3682_v4, 0.0  ;;  %v2855_v15 = vmax.f32 %v3686_v5, 0.0 }
 0x345   :  { %v2856_v43 = vmax.f32 %v3683_v44, 0.0  ;;  %v2858_v48 = vmax.f32 %v3687_v8, 0.0 }
 0x346   :  { %v2857_v16 = vmax.f32 %v3684_v10, 0.0  ;;  %v2859_v17 = vmax.f32 %v3688_v11, 0.0 }
 0x347   :  { %v2860_v18 = vpack.c.bf16 %v2856_v43, %v2852_v47  ;;  %v2862_v19 = vpack.c.bf16 %v2858_v48, %v2854_v12 }
 0x348   :  { %v2861_v20 = vpack.c.bf16 %v2857_v16, %v2853_v13  ;;  %v2863_v21 = vpack.c.bf16 %v2859_v17, %v2855_v15 }
 0x34a   :  { %3159 = vmatprep.mubr.bf16.mxu0 %v2861_v20  ;;  %3200 = vmatprep.mubr.bf16.mxu1 %v2863_v21 }
 0x34b   :  { %3160 = vmatmul.mubr.bf16.vlgmr.msra.gmra.mrb[8].mxu0 %v2860_v18  ;;  %3201 = vmatmul.mubr.bf16.vlgmr.msra.gmra.mrb[8].mxu1 %v2862_v19 }
 0x41e   :  { %v3653_v22 = vpop.f32.mrb[8].mxu0  ;;  %v3675_v23 = vpop.f32.mrb[8].mxu1 }
 0x41f   :  { %v3654_v25 = vpop.f32.mrb[9].mxu0  ;;  %v3676_v26 = vpop.f32.mrb[9].mxu1 }
 0x420   :  { %v3655_v27 = vadd.f32 %v3654_v25, %v3653_v22  ;;  %v3677_v28 = vadd.f32 %v3676_v26, %v3675_v23  ;;  %v3656_v29 = vpop.f32.mrb[10].mxu0  ;;  %v3678_v30 = vpop.f32.mrb[10].mxu1 }
 0x421   :  { %v3657_v31 = vpop.f32.mrb[11].mxu0  ;;  %v3679_v32 = vpop.f32.mrb[11].mxu1 }
 0x422   :  { %v3162_v33 = vadd.f32 %v3655_v27, %v3602_v24  ;;  %v3658_v34 = vadd.f32 %v3657_v31, %v3656_v29  ;;  %v3680_v35 = vadd.f32 %v3679_v32, %v3678_v30 }
 0x424   :  { %v3203_v14 = vadd.f32 %v3677_v28, %v3162_v33  ;;  %v3165_v36 = vadd.f32 %v3658_v34, %v3602_v24 }
 0x426   :  { %v3635_v37 = vmul.f32 -1.442695, %v3203_v14  ;;  %v3206_v38 = vadd.f32 %v3680_v35, %v3165_v36 }
 0x428   :  { %4307 = vpow2.f32 %v3635_v37  ;;  %v3636_v39 = vmul.f32 -1.442695, %v3206_v38 }
 0x42a   :  { %4309 = vpow2.f32 %v3636_v39 }
 0x432   :  { %v4308_v40 = vpop.eup %4307 }
 0x433   :  { %v3215_v41 = vadd.f32 1.0, %v4308_v40 }
 0x434   :  { %v4310_v42 = vpop.eup %4309 }
 0x435   :  { %4311 = vrcp.f32 %v3215_v41  ;;  %v3216_v46 = vadd.f32 1.0, %v4310_v42 }
 0x437   :  { %4313 = vrcp.f32 %v3216_v46 }
 0x43f   :  { %v4312_v49 = vpop.eup %4311 }
 0x440   :  { %3221 = vst [vmem:[#allocation13] sm:$0xff] %v4312_v49 }
 0x441   :  { %v4314_v50 = vpop.eup %4313 }
 0x442   :  { %3222 = vst [vmem:[#allocation13 + $0x8] sm:$0xff] %v4314_v50 }
 0x443   :  { %4458 = shalt.err (!%p4455_p10)
}
 0x444   :  { %s4459_s25 = scalar_lea.hbm %s4685_s9, 256 }
 0x445   :  { %p4460_p11 = scmp.ne.s32.totalorder %s4685_s9, %s4459_s25  ;;  %p4463_p12 = scmp.lt.u32.totalorder %s4459_s25, %s4685_s9 }
 0x447   :  { %p4465_p13 = pnand %p4463_p12, %p4460_p11 }
 0x449   :  { %4468 = shalt.err (!%p4465_p13)
}
 0x44a   :  { %s4493_s28 = smov 128   ;;  %s4494_s29 = smov 8  }
 0x44b   :  { %3234 = dma.vmem_to_hbm [thread:$0]  %s3229_s20, 256, %s4685_s9, [#allocation4], %s4493_s28, %s4493_s28, %s4494_s29  }
 0x44c   :  { %4477 = dma.done.wait [#allocation4], 256  }
 0x44d   :  { %4478 = vsyncadd [#allocation4], 4294967040 }
 0x44e   :  { %3238 = vsyncpa [#allocation3], 1 }
 0x44f   :  { %3239 = vsyncpa [#allocation6], 1 }
 0x450   :  { %3240 = vsyncpa [#allocation9], 1 }
 0x451   :  { %3241 = vsyncpa [#allocation12], 1 }
 0x452   :  { %3242 = vsyncpa [#allocation4], 1 }

</bundles_post_ra>
